<compile_context>
chip_gen: v7x
topology: tpu7x:2x2x1
jax: 0.10.0
libtpu: 0.0.40
codegen_flags: <defaults>
</compile_context>

<pallas_src>
from functools import partial

import numpy as np
import jax
import jax.numpy as jnp
from jax import lax
from jax.experimental import pallas as pl
from jax.experimental.pallas import tpu as pltpu

LANES = 128  # every activation slab / conv output is kept exactly 128 lanes wide


# ----------------------------------------------------------------------------
# Fused whole-encoder Pallas kernel
# ----------------------------------------------------------------------------
def _encoder_kernel(*refs, batch, dims, eps, negative_slope):
    # ref layout: [x, (Wr, G, GT, gamma, beta) * n_conv, Wl, b_lin, out, act_scratch]
    n_conv = len(dims)
    idx = 0
    x_ref = refs[idx]; idx += 1
    layers = []
    for _ in range(n_conv):
        layers.append(refs[idx:idx + 5]); idx += 5
    wl_ref = refs[idx]; bl_ref = refs[idx + 1]
    out_ref = refs[idx + 2]
    act_ref = refs[idx + 3]

    f32, bf16 = jnp.float32, jnp.bfloat16
    zrow = jnp.zeros((1, LANES), f32)

    def store_padded(y, h):
        # y: (batch*h, 128) f32 -> per-image layout [guard row, h rows, guard row]
        pieces = []
        for nb in range(batch):
            pieces += [zrow, y[nb * h:(nb + 1) * h, :], zrow]
        act_ref[pl.ds(0, batch * (h + 2)), :] = jnp.concatenate(pieces, axis=0)

    # ---- Stage the (N*H, W*C) input slab into the guard-padded scratch,
    #      lane-padded with zeros to 128 (layer-1 slab is 96 lanes here).
    x = x_ref[...]
    if x.shape[1] < LANES:
        x = jnp.concatenate(
            [x, jnp.zeros((x.shape[0], LANES - x.shape[1]), f32)], axis=1)
    store_padded(x, dims[0][0])

    act = None
    for li, ((wr_ref, g_ref, gt_ref, gamma_ref, beta_ref),
             (h_in, h_out, w_out)) in enumerate(zip(layers, dims)):
        # ---- Conv2d(k=4, s=2, p=1, bias=False):
        #      4 strided sublane tap reads (guard rows supply the h-padding and
        #      isolate batch images) -> lane-concat -> ONE deep-K bf16 MXU dot.
        taps = []
        for kh in range(4):
            taps.append(jnp.concatenate(
                [act_ref[pl.ds(nb * (h_in + 2) + kh, h_out, 2), :]
                 for nb in range(batch)], axis=0))          # (N*Ho, 128)
        gathered = jnp.concatenate(taps, axis=1).astype(bf16)   # (N*Ho, 4*128)
        acc = jnp.dot(gathered, wr_ref[...],
                      preferred_element_type=f32)               # (N*Ho, 128) f32

        # ---- BatchNorm2d (training batch stats); stats path kept fully f32.
        s1 = jnp.sum(acc, axis=0, keepdims=True)                # (1, 128)
        s2 = jnp.sum(acc * acc, axis=0, keepdims=True)
        sums = jnp.dot(jnp.concatenate([s1, s2], axis=0), g_ref[...],
                       preferred_element_type=f32)              # (2, Cout)
        inv_n = 1.0 / (batch * h_out * w_out)
        mean = sums[0:1, :] * inv_n
        var = sums[1:2, :] * inv_n - mean * mean
        scale = gamma_ref[...] * lax.rsqrt(var + eps)           # (1, Cout)
        shift = beta_ref[...] - mean * scale
        ssb = jnp.dot(jnp.concatenate([scale, shift], axis=0), gt_ref[...],
                      preferred_element_type=f32)               # (2, 128)
        y = acc * ssb[0:1, :] + ssb[1:2, :]

        # ---- LeakyReLU(0.2)
        act = jnp.where(y >= 0, y, negative_slope * y)

        if li + 1 < n_conv:          # last layer feeds the linear head directly
            store_padded(act, h_out)

    # ---- Flatten (PyTorch NCHW order folded into Wl) + Linear + ReLU.
    #      Output is lane-dense (128 wide); wrapper slices the real features.
    h4 = dims[-1][1]
    per_img = []
    for nb in range(batch):
        rows = [act[nb * h4 + h: nb * h4 + h + 1, :] for h in range(h4)]
        per_img.append(jnp.concatenate(rows, axis=1))           # (1, h4*128)
    z = jnp.dot(jnp.concatenate(per_img, axis=0).astype(bf16), wl_ref[...],
                preferred_element_type=f32) + bl_ref[...]       # (N, 128)
    out_ref[...] = jnp.maximum(z, 0.0).astype(out_ref.dtype)


def vae_encoder_forward(x_nchw, ops, *, static):
    """Full VAE_Encoder forward (latent_dim=1 path) in one pallas_call."""
    batch = static["batch"]
    dims = static["dims"]
    feature_size = static["feature_size"]

    n, c, h, w = x_nchw.shape
    # NCHW -> (N*H, W*C) channels-last slab (input-only layout glue).
    x_flat = jnp.transpose(x_nchw, (0, 2, 3, 1)).reshape(n * h, w * c)

    inputs = [x_flat]
    for layer_ops in ops["conv"]:
        inputs.extend(layer_ops)
    inputs.extend([ops["wl"], ops["b_lin"]])

    kernel = partial(_encoder_kernel, batch=batch, dims=dims,
                     eps=1e-5, negative_slope=0.2)

    in_specs = [pl.BlockSpec(a.shape, lambda i: (0, 0)) for a in inputs]
    out = pl.pallas_call(
        kernel,
        out_shape=jax.ShapeDtypeStruct((batch, LANES), jnp.float32),
        grid=(1,),
        in_specs=in_specs,
        out_specs=pl.BlockSpec((batch, LANES), lambda i: (0, 0)),
        scratch_shapes=[pltpu.VMEM((batch * (dims[0][0] + 2), LANES),
                                   jnp.float32)],
        compiler_params=pltpu.CompilerParams(
            dimension_semantics=("arbitrary",),
            vmem_limit_bytes=4 * 1024 * 1024),   # ~1.5 MiB actual footprint
    )(*inputs)
    return out[:, :feature_size]


# ----------------------------------------------------------------------------
# One-time operand construction (fold conv geometry / padding / flatten order
# into dense matmul operands; all tiny, done at init).
# ----------------------------------------------------------------------------
def _build_conv_operands(w_oihw, w_in):
    c_out, c_in = w_oihw.shape[0], w_oihw.shape[1]
    w_out = w_in // 2
    # TODO(synk): lane-tile the slab if W*C exceeds 128 (larger images/channels).
    assert w_in * c_in <= LANES and w_out * c_out <= LANES

    # One stacked (4*128, 128) weight: kh taps stacked along K, kw taps and the
    # zero column-padding folded in, zero rows/cols for unused (padded) lanes.
    wr = np.zeros((4 * LANES, LANES), np.float32)
    for kh in range(4):
        for j in range(w_out):
            for kw in range(4):
                ww = 2 * j + kw - 1
                if 0 <= ww < w_in:
                    wr[kh * LANES + ww * c_in: kh * LANES + (ww + 1) * c_in,
                       j * c_out:(j + 1) * c_out] = w_oihw[:, :, kh, kw].T

    # Group-reduce / broadcast matrices for per-channel BatchNorm stats.
    g = np.zeros((LANES, c_out), np.float32)
    for j in range(w_out):
        g[j * c_out:(j + 1) * c_out, :] = np.eye(c_out, dtype=np.float32)
    gt = np.ascontiguousarray(g.T)                       # (Cout, 128)
    return wr, g, gt


def _build_linear_operands(w_lin, b_lin, h4, w4, c4):
    # Folds PyTorch Flatten (NCHW order) into the Linear weights; lane-dense
    # (128-wide) output with zero columns beyond feature_size.
    n_pix, feat = w_lin.shape
    assert feat <= LANES and w4 * c4 <= LANES
    wl = np.zeros((h4 * LANES, LANES), np.float32)
    for h in range(h4):
        for w in range(w4):
            for c in range(c4):
                wl[h * LANES + w * c4 + c, :feat] = w_lin[c * h4 * w4 + h * w4 + w, :]
    b = np.zeros((1, LANES), np.float32)
    b[0, :feat] = b_lin
    return wl, b


def init_params(key, input_c, input_h, input_w, n_conv, first_c,
                feature_size, batch):
    conv_raw = []
    in_c = input_c
    for i in range(n_conv):
        out_c = first_c * (2 ** i)
        key, k1, k2, k3 = jax.random.split(key, 4)
        w = jax.random.normal(k1, (out_c, in_c, 4, 4), jnp.float32)
        w = w / np.sqrt(in_c * 16.0)                     # (Cout, Cin, KH, KW)
        gamma = 1.0 + 0.1 * jax.random.normal(k2, (1, out_c), jnp.float32)
        beta = 0.1 * jax.random.normal(k3, (1, out_c), jnp.float32)
        conv_raw.append((w, gamma, beta))
        in_c = out_c

    h_f, w_f = input_h // (2 ** n_conv), input_w // (2 ** n_conv)
    c_f = first_c * (2 ** (n_conv - 1))
    n_pix = c_f * h_f * w_f
    key, k1, k2 = jax.random.split(key, 3)
    w_lin = jax.random.normal(k1, (n_pix, feature_size), jnp.float32) / np.sqrt(n_pix)
    b_lin = 0.1 * jax.random.normal(k2, (1, feature_size), jnp.float32)

    # Fold geometry into fused-kernel operands.
    conv_ops, dims = [], []
    h_in, w_in = input_h, input_w
    for (w, gamma, beta) in conv_raw:
        wr, g, gt = _build_conv_operands(np.asarray(w), w_in)
        conv_ops.append((jnp.asarray(wr, jnp.bfloat16),   # bf16: halves weight DMA
                         jnp.asarray(g, jnp.float32),     # f32: BN stats stay f32
                         jnp.asarray(gt, jnp.float32),
                         gamma, beta))
        dims.append((h_in, h_in // 2, w_in // 2))
        h_in, w_in = h_in // 2, w_in // 2
    wl, b_pad = _build_linear_operands(np.asarray(w_lin),
                                       np.asarray(b_lin).reshape(-1),
                                       h_f, w_f, c_f)

    params = {
        "raw": {"conv": conv_raw, "w_lin": w_lin, "b_lin": b_lin},
        "pallas": {"conv": conv_ops,
                   "wl": jnp.asarray(wl, jnp.bfloat16),
                   "b_lin": jnp.asarray(b_pad, jnp.float32)},
    }
    static = {"batch": batch, "dims": tuple(dims), "feature_size": feature_size}
    return params, static


# ----------------------------------------------------------------------------
# Pure-JAX reference (no Pallas) for correctness check
# ----------------------------------------------------------------------------
def reference_forward(x_nchw, params):
    raw = params["raw"]
    x = jnp.transpose(x_nchw, (0, 2, 3, 1))
    for (w, gamma, beta) in raw["conv"]:
        w_hwio = jnp.transpose(w, (2, 3, 1, 0))
        y = lax.conv_general_dilated(x, w_hwio, window_strides=(2, 2),
                                     padding=((1, 1), (1, 1)),
                                     dimension_numbers=("NHWC", "HWIO", "NHWC"))
        mean = jnp.mean(y, axis=(0, 1, 2), keepdims=True)
        var = jnp.mean((y - mean) ** 2, axis=(0, 1, 2), keepdims=True)
        y = (y - mean) * (gamma.reshape(1, 1, 1, -1) * lax.rsqrt(var + 1e-5)) \
            + beta.reshape(1, 1, 1, -1)
        x = jnp.where(y >= 0, y, 0.2 * y)
    feat = jnp.transpose(x, (0, 3, 1, 2)).reshape(x.shape[0], -1)
    z = feat @ raw["w_lin"] + raw["b_lin"]
    return jnp.maximum(z, 0.0)


if __name__ == "__main__":
    # VAE_Encoder(input_shape=(3,32,32), n_conv=4, first_layer_channels=8,
    #             latent_dim=1, feature_size=64)
    # TODO(synk): latent_dim=2 head (3x3 conv + ReLU) not implemented; only the
    #             default latent_dim=1 Flatten+Linear+ReLU path is fused here.
    BATCH, IN_C, IN_H, IN_W = 2, 3, 32, 32
    N_CONV, FIRST_C, FEATURE_SIZE = 4, 8, 64

    key = jax.random.PRNGKey(0)
    key, kx = jax.random.split(key)
    x = jax.random.normal(kx, (BATCH, IN_C, IN_H, IN_W), jnp.float32)

    params, static = init_params(key, IN_C, IN_H, IN_W, N_CONV, FIRST_C,
                                 FEATURE_SIZE, BATCH)

    fwd = jax.jit(partial(vae_encoder_forward, static=static))
    z = jax.block_until_ready(fwd(x, params["pallas"]))

    z_ref = jax.block_until_ready(reference_forward(x, params))
    # bf16 conv/linear operands with f32 accumulation -> a few % worst-case
    # deviation from the pure-f32 reference across 4 layers.
    np.testing.assert_allclose(np.asarray(z), np.asarray(z_ref),
                               rtol=3e-2, atol=3e-2)
    assert z.shape == (BATCH, FEATURE_SIZE)

    print("KERNEL_OK")
</pallas_src>

<mosaic_0001>
module attributes {stable_mosaic.version = 11 : i64} {
  func.func @_encoder_kernel(%arg0: i32, %arg1: memref<64x96xf32, #tpu.memory_space<vmem>>, %arg2: memref<512x128xbf16, #tpu.memory_space<vmem>>, %arg3: memref<128x8xf32, #tpu.memory_space<vmem>>, %arg4: memref<8x128xf32, #tpu.memory_space<vmem>>, %arg5: memref<1x8xf32, #tpu.memory_space<vmem>>, %arg6: memref<1x8xf32, #tpu.memory_space<vmem>>, %arg7: memref<512x128xbf16, #tpu.memory_space<vmem>>, %arg8: memref<128x16xf32, #tpu.memory_space<vmem>>, %arg9: memref<16x128xf32, #tpu.memory_space<vmem>>, %arg10: memref<1x16xf32, #tpu.memory_space<vmem>>, %arg11: memref<1x16xf32, #tpu.memory_space<vmem>>, %arg12: memref<512x128xbf16, #tpu.memory_space<vmem>>, %arg13: memref<128x32xf32, #tpu.memory_space<vmem>>, %arg14: memref<32x128xf32, #tpu.memory_space<vmem>>, %arg15: memref<1x32xf32, #tpu.memory_space<vmem>>, %arg16: memref<1x32xf32, #tpu.memory_space<vmem>>, %arg17: memref<512x128xbf16, #tpu.memory_space<vmem>>, %arg18: memref<128x64xf32, #tpu.memory_space<vmem>>, %arg19: memref<64x128xf32, #tpu.memory_space<vmem>>, %arg20: memref<1x64xf32, #tpu.memory_space<vmem>>, %arg21: memref<1x64xf32, #tpu.memory_space<vmem>>, %arg22: memref<256x128xbf16, #tpu.memory_space<vmem>>, %arg23: memref<1x128xf32, #tpu.memory_space<vmem>>, %arg24: memref<2x128xf32, #tpu.memory_space<vmem>>, %arg25: memref<68x128xf32, #tpu.memory_space<vmem>>) attributes {dimension_semantics = [#tpu.dimension_semantics<arbitrary>], iteration_bounds = array<i64: 1>, scalar_prefetch = 0 : i64, scratch_operands = 1 : i64, tpu.core_type = #tpu.core_type<tc>, window_params = [{pipeline_mode = #tpu.pipeline_mode<synchronous>, transform_indices = @transform_0, window_bounds = array<i64: 64, 96>}, {pipeline_mode = #tpu.pipeline_mode<synchronous>, transform_indices = @transform_1, window_bounds = array<i64: 512, 128>}, {pipeline_mode = #tpu.pipeline_mode<synchronous>, transform_indices = @transform_2, window_bounds = array<i64: 128, 8>}, {pipeline_mode = #tpu.pipeline_mode<synchronous>, transform_indices = @transform_3, window_bounds = array<i64: 8, 128>}, {pipeline_mode = #tpu.pipeline_mode<synchronous>, transform_indices = @transform_4, window_bounds = array<i64: 1, 8>}, {pipeline_mode = #tpu.pipeline_mode<synchronous>, transform_indices = @transform_5, window_bounds = array<i64: 1, 8>}, {pipeline_mode = #tpu.pipeline_mode<synchronous>, transform_indices = @transform_6, window_bounds = array<i64: 512, 128>}, {pipeline_mode = #tpu.pipeline_mode<synchronous>, transform_indices = @transform_7, window_bounds = array<i64: 128, 16>}, {pipeline_mode = #tpu.pipeline_mode<synchronous>, transform_indices = @transform_8, window_bounds = array<i64: 16, 128>}, {pipeline_mode = #tpu.pipeline_mode<synchronous>, transform_indices = @transform_9, window_bounds = array<i64: 1, 16>}, {pipeline_mode = #tpu.pipeline_mode<synchronous>, transform_indices = @transform_10, window_bounds = array<i64: 1, 16>}, {pipeline_mode = #tpu.pipeline_mode<synchronous>, transform_indices = @transform_11, window_bounds = array<i64: 512, 128>}, {pipeline_mode = #tpu.pipeline_mode<synchronous>, transform_indices = @transform_12, window_bounds = array<i64: 128, 32>}, {pipeline_mode = #tpu.pipeline_mode<synchronous>, transform_indices = @transform_13, window_bounds = array<i64: 32, 128>}, {pipeline_mode = #tpu.pipeline_mode<synchronous>, transform_indices = @transform_14, window_bounds = array<i64: 1, 32>}, {pipeline_mode = #tpu.pipeline_mode<synchronous>, transform_indices = @transform_15, window_bounds = array<i64: 1, 32>}, {pipeline_mode = #tpu.pipeline_mode<synchronous>, transform_indices = @transform_16, window_bounds = array<i64: 512, 128>}, {pipeline_mode = #tpu.pipeline_mode<synchronous>, transform_indices = @transform_17, window_bounds = array<i64: 128, 64>}, {pipeline_mode = #tpu.pipeline_mode<synchronous>, transform_indices = @transform_18, window_bounds = array<i64: 64, 128>}, {pipeline_mode = #tpu.pipeline_mode<synchronous>, transform_indices = @transform_19, window_bounds = array<i64: 1, 64>}, {pipeline_mode = #tpu.pipeline_mode<synchronous>, transform_indices = @transform_20, window_bounds = array<i64: 1, 64>}, {pipeline_mode = #tpu.pipeline_mode<synchronous>, transform_indices = @transform_21, window_bounds = array<i64: 256, 128>}, {pipeline_mode = #tpu.pipeline_mode<synchronous>, transform_indices = @transform_22, window_bounds = array<i64: 1, 128>}, {pipeline_mode = #tpu.pipeline_mode<synchronous>, transform_indices = @transform_23, window_bounds = array<i64: 2, 128>}]} {
    %cst = arith.constant 0.000000e+00 : f32
    %0 = vector.broadcast %cst : f32 to vector<1x128xf32>
    %c0 = arith.constant 0 : index
    %c0_0 = arith.constant 0 : index
    %1 = vector.load %arg1[%c0, %c0_0] : memref<64x96xf32, #tpu.memory_space<vmem>>, vector<64x96xf32>
    %cst_1 = arith.constant 0.000000e+00 : f32
    %2 = vector.broadcast %cst_1 : f32 to vector<64x32xf32>
    %3 = tpu.concatenate %1, %2 in 1 : vector<64x96xf32>, vector<64x32xf32> -> vector<64x128xf32>
    %4 = vector.extract_strided_slice %3 {offsets = [0, 0], sizes = [32, 128], strides = [1, 1]} : vector<64x128xf32> to vector<32x128xf32>
    %5 = vector.extract_strided_slice %3 {offsets = [32, 0], sizes = [32, 128], strides = [1, 1]} : vector<64x128xf32> to vector<32x128xf32>
    %6 = tpu.concatenate %0, %4, %0, %0, %5, %0 in 0 : vector<1x128xf32>, vector<32x128xf32>, vector<1x128xf32>, vector<1x128xf32>, vector<32x128xf32>, vector<1x128xf32> -> vector<68x128xf32>
    %c0_2 = arith.constant 0 : index
    %c0_3 = arith.constant 0 : index
    %7 = vector.load %arg25[%c0_2, %c0_3] : memref<68x128xf32, #tpu.memory_space<vmem>>, vector<68x128xf32>
    tpu.vector_store %arg25[%c0_2, %c0_3], %6 {strides = array<i32>} : memref<68x128xf32, #tpu.memory_space<vmem>>, vector<68x128xf32>,
    %c0_4 = arith.constant 0 : index
    %c0_5 = arith.constant 0 : index
    %8 = tpu.strided_load %arg25[%c0_4, %c0_5] {strides = array<i32: 2, 1>} : memref<68x128xf32, #tpu.memory_space<vmem>>, vector<16x128xf32>
    %c34 = arith.constant 34 : index
    %c0_6 = arith.constant 0 : index
    %9 = tpu.strided_load %arg25[%c34, %c0_6] {strides = array<i32: 2, 1>} : memref<68x128xf32, #tpu.memory_space<vmem>>, vector<16x128xf32>
    %10 = tpu.concatenate %8, %9 in 0 : vector<16x128xf32>, vector<16x128xf32> -> vector<32x128xf32>
    %c1 = arith.constant 1 : index
    %c0_7 = arith.constant 0 : index
    %11 = tpu.strided_load %arg25[%c1, %c0_7] {strides = array<i32: 2, 1>} : memref<68x128xf32, #tpu.memory_space<vmem>>, vector<16x128xf32>
    %c35 = arith.constant 35 : index
    %c0_8 = arith.constant 0 : index
    %12 = tpu.strided_load %arg25[%c35, %c0_8] {strides = array<i32: 2, 1>} : memref<68x128xf32, #tpu.memory_space<vmem>>, vector<16x128xf32>
    %13 = tpu.concatenate %11, %12 in 0 : vector<16x128xf32>, vector<16x128xf32> -> vector<32x128xf32>
    %c2 = arith.constant 2 : index
    %c0_9 = arith.constant 0 : index
    %14 = tpu.strided_load %arg25[%c2, %c0_9] {strides = array<i32: 2, 1>} : memref<68x128xf32, #tpu.memory_space<vmem>>, vector<16x128xf32>
    %c36 = arith.constant 36 : index
    %c0_10 = arith.constant 0 : index
    %15 = tpu.strided_load %arg25[%c36, %c0_10] {strides = array<i32: 2, 1>} : memref<68x128xf32, #tpu.memory_space<vmem>>, vector<16x128xf32>
    %16 = tpu.concatenate %14, %15 in 0 : vector<16x128xf32>, vector<16x128xf32> -> vector<32x128xf32>
    %c3 = arith.constant 3 : index
    %c0_11 = arith.constant 0 : index
    %17 = tpu.strided_load %arg25[%c3, %c0_11] {strides = array<i32: 2, 1>} : memref<68x128xf32, #tpu.memory_space<vmem>>, vector<16x128xf32>
    %c37 = arith.constant 37 : index
    %c0_12 = arith.constant 0 : index
    %18 = tpu.strided_load %arg25[%c37, %c0_12] {strides = array<i32: 2, 1>} : memref<68x128xf32, #tpu.memory_space<vmem>>, vector<16x128xf32>
    %19 = tpu.concatenate %17, %18 in 0 : vector<16x128xf32>, vector<16x128xf32> -> vector<32x128xf32>
    %20 = tpu.concatenate %10, %13, %16, %19 in 1 : vector<32x128xf32>, vector<32x128xf32>, vector<32x128xf32>, vector<32x128xf32> -> vector<32x512xf32>
    %21 = arith.truncf %20 : vector<32x512xf32> to vector<32x512xbf16>
    %c0_13 = arith.constant 0 : index
    %c0_14 = arith.constant 0 : index
    %22 = vector.load %arg2[%c0_13, %c0_14] : memref<512x128xbf16, #tpu.memory_space<vmem>>, vector<512x128xbf16>
    %cst_15 = arith.constant dense<0.000000e+00> : vector<32x128xf32>
    %23 = tpu.matmul %21, %22, %cst_15 {dimension_numbers = #tpu.dot_dimension_numbers<[1], [0], [0], [1], [0, 0, 1, 1], [], []>} : vector<32x512xbf16>, vector<512x128xbf16>, vector<32x128xf32> -> vector<32x128xf32>
    %cst_16 = arith.constant dense<0.000000e+00> : vector<128xf32>
    %24 = vector.multi_reduction <add>, %23, %cst_16 [0] : vector<32x128xf32> to vector<128xf32>
    %25 = vector.shape_cast %24 : vector<128xf32> to vector<1x128xf32>
    %26 = arith.mulf %23, %23 : vector<32x128xf32>
    %cst_17 = arith.constant dense<0.000000e+00> : vector<128xf32>
    %27 = vector.multi_reduction <add>, %26, %cst_17 [0] : vector<32x128xf32> to vector<128xf32>
    %28 = vector.shape_cast %27 : vector<128xf32> to vector<1x128xf32>
    %29 = tpu.concatenate %25, %28 in 0 : vector<1x128xf32>, vector<1x128xf32> -> vector<2x128xf32>
    %c0_18 = arith.constant 0 : index
    %c0_19 = arith.constant 0 : index
    %30 = vector.load %arg3[%c0_18, %c0_19] : memref<128x8xf32, #tpu.memory_space<vmem>>, vector<128x8xf32>
    %cst_20 = arith.constant dense<0.000000e+00> : vector<2x8xf32>
    %31 = tpu.matmul %29, %30, %cst_20 {dimension_numbers = #tpu.dot_dimension_numbers<[1], [0], [0], [1], [0, 0, 1, 1], [], []>} : vector<2x128xf32>, vector<128x8xf32>, vector<2x8xf32> -> vector<2x8xf32>
    %32 = vector.extract_strided_slice %31 {offsets = [0, 0], sizes = [1, 8], strides = [1, 1]} : vector<2x8xf32> to vector<1x8xf32>
    %cst_21 = arith.constant 0.001953125 : f32
    %33 = vector.broadcast %cst_21 : f32 to vector<1x8xf32>
    %34 = arith.mulf %32, %33 : vector<1x8xf32>
    %35 = vector.extract_strided_slice %31 {offsets = [1, 0], sizes = [1, 8], strides = [1, 1]} : vector<2x8xf32> to vector<1x8xf32>
    %cst_22 = arith.constant 0.001953125 : f32
    %36 = vector.broadcast %cst_22 : f32 to vector<1x8xf32>
    %37 = arith.mulf %35, %36 : vector<1x8xf32>
    %38 = arith.mulf %34, %34 : vector<1x8xf32>
    %39 = arith.subf %37, %38 : vector<1x8xf32>
    %c0_23 = arith.constant 0 : index
    %c0_24 = arith.constant 0 : index
    %40 = vector.load %arg5[%c0_23, %c0_24] : memref<1x8xf32, #tpu.memory_space<vmem>>, vector<1x8xf32>
    %cst_25 = arith.constant 9.99999974E-6 : f32
    %41 = vector.broadcast %cst_25 : f32 to vector<1x8xf32>
    %42 = arith.addf %39, %41 : vector<1x8xf32>
    %43 = math.rsqrt %42 : vector<1x8xf32>
    %44 = arith.mulf %40, %43 : vector<1x8xf32>
    %c0_26 = arith.constant 0 : index
    %c0_27 = arith.constant 0 : index
    %45 = vector.load %arg6[%c0_26, %c0_27] : memref<1x8xf32, #tpu.memory_space<vmem>>, vector<1x8xf32>
    %46 = arith.mulf %34, %44 : vector<1x8xf32>
    %47 = arith.subf %45, %46 : vector<1x8xf32>
    %48 = tpu.concatenate %44, %47 in 0 : vector<1x8xf32>, vector<1x8xf32> -> vector<2x8xf32>
    %c0_28 = arith.constant 0 : index
    %c0_29 = arith.constant 0 : index
    %49 = vector.load %arg4[%c0_28, %c0_29] : memref<8x128xf32, #tpu.memory_space<vmem>>, vector<8x128xf32>
    %cst_30 = arith.constant dense<0.000000e+00> : vector<2x128xf32>
    %50 = tpu.matmul %48, %49, %cst_30 {dimension_numbers = #tpu.dot_dimension_numbers<[1], [0], [0], [1], [0, 0, 1, 1], [], []>} : vector<2x8xf32>, vector<8x128xf32>, vector<2x128xf32> -> vector<2x128xf32>
    %51 = vector.extract_strided_slice %50 {offsets = [0, 0], sizes = [1, 128], strides = [1, 1]} : vector<2x128xf32> to vector<1x128xf32>
    %52 = vector.broadcast %51 : vector<1x128xf32> to vector<32x128xf32>
    %53 = arith.mulf %23, %52 : vector<32x128xf32>
    %54 = vector.extract_strided_slice %50 {offsets = [1, 0], sizes = [1, 128], strides = [1, 1]} : vector<2x128xf32> to vector<1x128xf32>
    %55 = vector.broadcast %54 : vector<1x128xf32> to vector<32x128xf32>
    %56 = arith.addf %53, %55 : vector<32x128xf32>
    %cst_31 = arith.constant 0.000000e+00 : f32
    %57 = vector.broadcast %cst_31 : f32 to vector<32x128xf32>
    %58 = arith.cmpf oge, %56, %57 : vector<32x128xf32>
    %cst_32 = arith.constant 2.000000e-01 : f32
    %59 = vector.broadcast %cst_32 : f32 to vector<32x128xf32>
    %60 = arith.mulf %59, %56 : vector<32x128xf32>
    %61 = arith.select %58, %56, %60 : vector<32x128xi1>, vector<32x128xf32>
    %62 = vector.extract_strided_slice %61 {offsets = [0, 0], sizes = [16, 128], strides = [1, 1]} : vector<32x128xf32> to vector<16x128xf32>
    %63 = vector.extract_strided_slice %61 {offsets = [16, 0], sizes = [16, 128], strides = [1, 1]} : vector<32x128xf32> to vector<16x128xf32>
    %64 = tpu.concatenate %0, %62, %0, %0, %63, %0 in 0 : vector<1x128xf32>, vector<16x128xf32>, vector<1x128xf32>, vector<1x128xf32>, vector<16x128xf32>, vector<1x128xf32> -> vector<36x128xf32>
    %c0_33 = arith.constant 0 : index
    %c0_34 = arith.constant 0 : index
    %65 = vector.load %arg25[%c0_33, %c0_34] : memref<68x128xf32, #tpu.memory_space<vmem>>, vector<36x128xf32>
    tpu.vector_store %arg25[%c0_33, %c0_34], %64 {strides = array<i32>} : memref<68x128xf32, #tpu.memory_space<vmem>>, vector<36x128xf32>,
    %c0_35 = arith.constant 0 : index
    %c0_36 = arith.constant 0 : index
    %66 = tpu.strided_load %arg25[%c0_35, %c0_36] {strides = array<i32: 2, 1>} : memref<68x128xf32, #tpu.memory_space<vmem>>, vector<8x128xf32>
    %c18 = arith.constant 18 : index
    %c0_37 = arith.constant 0 : index
    %67 = tpu.strided_load %arg25[%c18, %c0_37] {strides = array<i32: 2, 1>} : memref<68x128xf32, #tpu.memory_space<vmem>>, vector<8x128xf32>
    %68 = tpu.concatenate %66, %67 in 0 : vector<8x128xf32>, vector<8x128xf32> -> vector<16x128xf32>
    %c1_38 = arith.constant 1 : index
    %c0_39 = arith.constant 0 : index
    %69 = tpu.strided_load %arg25[%c1_38, %c0_39] {strides = array<i32: 2, 1>} : memref<68x128xf32, #tpu.memory_space<vmem>>, vector<8x128xf32>
    %c19 = arith.constant 19 : index
    %c0_40 = arith.constant 0 : index
    %70 = tpu.strided_load %arg25[%c19, %c0_40] {strides = array<i32: 2, 1>} : memref<68x128xf32, #tpu.memory_space<vmem>>, vector<8x128xf32>
    %71 = tpu.concatenate %69, %70 in 0 : vector<8x128xf32>, vector<8x128xf32> -> vector<16x128xf32>
    %c2_41 = arith.constant 2 : index
    %c0_42 = arith.constant 0 : index
    %72 = tpu.strided_load %arg25[%c2_41, %c0_42] {strides = array<i32: 2, 1>} : memref<68x128xf32, #tpu.memory_space<vmem>>, vector<8x128xf32>
    %c20 = arith.constant 20 : index
    %c0_43 = arith.constant 0 : index
    %73 = tpu.strided_load %arg25[%c20, %c0_43] {strides = array<i32: 2, 1>} : memref<68x128xf32, #tpu.memory_space<vmem>>, vector<8x128xf32>
    %74 = tpu.concatenate %72, %73 in 0 : vector<8x128xf32>, vector<8x128xf32> -> vector<16x128xf32>
    %c3_44 = arith.constant 3 : index
    %c0_45 = arith.constant 0 : index
    %75 = tpu.strided_load %arg25[%c3_44, %c0_45] {strides = array<i32: 2, 1>} : memref<68x128xf32, #tpu.memory_space<vmem>>, vector<8x128xf32>
    %c21 = arith.constant 21 : index
    %c0_46 = arith.constant 0 : index
    %76 = tpu.strided_load %arg25[%c21, %c0_46] {strides = array<i32: 2, 1>} : memref<68x128xf32, #tpu.memory_space<vmem>>, vector<8x128xf32>
    %77 = tpu.concatenate %75, %76 in 0 : vector<8x128xf32>, vector<8x128xf32> -> vector<16x128xf32>
    %78 = tpu.concatenate %68, %71, %74, %77 in 1 : vector<16x128xf32>, vector<16x128xf32>, vector<16x128xf32>, vector<16x128xf32> -> vector<16x512xf32>
    %79 = arith.truncf %78 : vector<16x512xf32> to vector<16x512xbf16>
    %c0_47 = arith.constant 0 : index
    %c0_48 = arith.constant 0 : index
    %80 = vector.load %arg7[%c0_47, %c0_48] : memref<512x128xbf16, #tpu.memory_space<vmem>>, vector<512x128xbf16>
    %cst_49 = arith.constant dense<0.000000e+00> : vector<16x128xf32>
    %81 = tpu.matmul %79, %80, %cst_49 {dimension_numbers = #tpu.dot_dimension_numbers<[1], [0], [0], [1], [0, 0, 1, 1], [], []>} : vector<16x512xbf16>, vector<512x128xbf16>, vector<16x128xf32> -> vector<16x128xf32>
    %cst_50 = arith.constant dense<0.000000e+00> : vector<128xf32>
    %82 = vector.multi_reduction <add>, %81, %cst_50 [0] : vector<16x128xf32> to vector<128xf32>
    %83 = vector.shape_cast %82 : vector<128xf32> to vector<1x128xf32>
    %84 = arith.mulf %81, %81 : vector<16x128xf32>
    %cst_51 = arith.constant dense<0.000000e+00> : vector<128xf32>
    %85 = vector.multi_reduction <add>, %84, %cst_51 [0] : vector<16x128xf32> to vector<128xf32>
    %86 = vector.shape_cast %85 : vector<128xf32> to vector<1x128xf32>
    %87 = tpu.concatenate %83, %86 in 0 : vector<1x128xf32>, vector<1x128xf32> -> vector<2x128xf32>
    %c0_52 = arith.constant 0 : index
    %c0_53 = arith.constant 0 : index
    %88 = vector.load %arg8[%c0_52, %c0_53] : memref<128x16xf32, #tpu.memory_space<vmem>>, vector<128x16xf32>
    %cst_54 = arith.constant dense<0.000000e+00> : vector<2x16xf32>
    %89 = tpu.matmul %87, %88, %cst_54 {dimension_numbers = #tpu.dot_dimension_numbers<[1], [0], [0], [1], [0, 0, 1, 1], [], []>} : vector<2x128xf32>, vector<128x16xf32>, vector<2x16xf32> -> vector<2x16xf32>
    %90 = vector.extract_strided_slice %89 {offsets = [0, 0], sizes = [1, 16], strides = [1, 1]} : vector<2x16xf32> to vector<1x16xf32>
    %cst_55 = arith.constant 7.812500e-03 : f32
    %91 = vector.broadcast %cst_55 : f32 to vector<1x16xf32>
    %92 = arith.mulf %90, %91 : vector<1x16xf32>
    %93 = vector.extract_strided_slice %89 {offsets = [1, 0], sizes = [1, 16], strides = [1, 1]} : vector<2x16xf32> to vector<1x16xf32>
    %cst_56 = arith.constant 7.812500e-03 : f32
    %94 = vector.broadcast %cst_56 : f32 to vector<1x16xf32>
    %95 = arith.mulf %93, %94 : vector<1x16xf32>
    %96 = arith.mulf %92, %92 : vector<1x16xf32>
    %97 = arith.subf %95, %96 : vector<1x16xf32>
    %c0_57 = arith.constant 0 : index
    %c0_58 = arith.constant 0 : index
    %98 = vector.load %arg10[%c0_57, %c0_58] : memref<1x16xf32, #tpu.memory_space<vmem>>, vector<1x16xf32>
    %cst_59 = arith.constant 9.99999974E-6 : f32
    %99 = vector.broadcast %cst_59 : f32 to vector<1x16xf32>
    %100 = arith.addf %97, %99 : vector<1x16xf32>
    %101 = math.rsqrt %100 : vector<1x16xf32>
    %102 = arith.mulf %98, %101 : vector<1x16xf32>
    %c0_60 = arith.constant 0 : index
    %c0_61 = arith.constant 0 : index
    %103 = vector.load %arg11[%c0_60, %c0_61] : memref<1x16xf32, #tpu.memory_space<vmem>>, vector<1x16xf32>
    %104 = arith.mulf %92, %102 : vector<1x16xf32>
    %105 = arith.subf %103, %104 : vector<1x16xf32>
    %106 = tpu.concatenate %102, %105 in 0 : vector<1x16xf32>, vector<1x16xf32> -> vector<2x16xf32>
    %c0_62 = arith.constant 0 : index
    %c0_63 = arith.constant 0 : index
    %107 = vector.load %arg9[%c0_62, %c0_63] : memref<16x128xf32, #tpu.memory_space<vmem>>, vector<16x128xf32>
    %cst_64 = arith.constant dense<0.000000e+00> : vector<2x128xf32>
    %108 = tpu.matmul %106, %107, %cst_64 {dimension_numbers = #tpu.dot_dimension_numbers<[1], [0], [0], [1], [0, 0, 1, 1], [], []>} : vector<2x16xf32>, vector<16x128xf32>, vector<2x128xf32> -> vector<2x128xf32>
    %109 = vector.extract_strided_slice %108 {offsets = [0, 0], sizes = [1, 128], strides = [1, 1]} : vector<2x128xf32> to vector<1x128xf32>
    %110 = vector.broadcast %109 : vector<1x128xf32> to vector<16x128xf32>
    %111 = arith.mulf %81, %110 : vector<16x128xf32>
    %112 = vector.extract_strided_slice %108 {offsets = [1, 0], sizes = [1, 128], strides = [1, 1]} : vector<2x128xf32> to vector<1x128xf32>
    %113 = vector.broadcast %112 : vector<1x128xf32> to vector<16x128xf32>
    %114 = arith.addf %111, %113 : vector<16x128xf32>
    %cst_65 = arith.constant 0.000000e+00 : f32
    %115 = vector.broadcast %cst_65 : f32 to vector<16x128xf32>
    %116 = arith.cmpf oge, %114, %115 : vector<16x128xf32>
    %cst_66 = arith.constant 2.000000e-01 : f32
    %117 = vector.broadcast %cst_66 : f32 to vector<16x128xf32>
    %118 = arith.mulf %117, %114 : vector<16x128xf32>
    %119 = arith.select %116, %114, %118 : vector<16x128xi1>, vector<16x128xf32>
    %120 = vector.extract_strided_slice %119 {offsets = [0, 0], sizes = [8, 128], strides = [1, 1]} : vector<16x128xf32> to vector<8x128xf32>
    %121 = vector.extract_strided_slice %119 {offsets = [8, 0], sizes = [8, 128], strides = [1, 1]} : vector<16x128xf32> to vector<8x128xf32>
    %122 = tpu.concatenate %0, %120, %0, %0, %121, %0 in 0 : vector<1x128xf32>, vector<8x128xf32>, vector<1x128xf32>, vector<1x128xf32>, vector<8x128xf32>, vector<1x128xf32> -> vector<20x128xf32>
    %c0_67 = arith.constant 0 : index
    %c0_68 = arith.constant 0 : index
    %123 = vector.load %arg25[%c0_67, %c0_68] : memref<68x128xf32, #tpu.memory_space<vmem>>, vector<20x128xf32>
    tpu.vector_store %arg25[%c0_67, %c0_68], %122 {strides = array<i32>} : memref<68x128xf32, #tpu.memory_space<vmem>>, vector<20x128xf32>,
    %c0_69 = arith.constant 0 : index
    %c0_70 = arith.constant 0 : index
    %124 = tpu.strided_load %arg25[%c0_69, %c0_70] {strides = array<i32: 2, 1>} : memref<68x128xf32, #tpu.memory_space<vmem>>, vector<4x128xf32>
    %c10 = arith.constant 10 : index
    %c0_71 = arith.constant 0 : index
    %125 = tpu.strided_load %arg25[%c10, %c0_71] {strides = array<i32: 2, 1>} : memref<68x128xf32, #tpu.memory_space<vmem>>, vector<4x128xf32>
    %126 = tpu.concatenate %124, %125 in 0 : vector<4x128xf32>, vector<4x128xf32> -> vector<8x128xf32>
    %c1_72 = arith.constant 1 : index
    %c0_73 = arith.constant 0 : index
    %127 = tpu.strided_load %arg25[%c1_72, %c0_73] {strides = array<i32: 2, 1>} : memref<68x128xf32, #tpu.memory_space<vmem>>, vector<4x128xf32>
    %c11 = arith.constant 11 : index
    %c0_74 = arith.constant 0 : index
    %128 = tpu.strided_load %arg25[%c11, %c0_74] {strides = array<i32: 2, 1>} : memref<68x128xf32, #tpu.memory_space<vmem>>, vector<4x128xf32>
    %129 = tpu.concatenate %127, %128 in 0 : vector<4x128xf32>, vector<4x128xf32> -> vector<8x128xf32>
    %c2_75 = arith.constant 2 : index
    %c0_76 = arith.constant 0 : index
    %130 = tpu.strided_load %arg25[%c2_75, %c0_76] {strides = array<i32: 2, 1>} : memref<68x128xf32, #tpu.memory_space<vmem>>, vector<4x128xf32>
    %c12 = arith.constant 12 : index
    %c0_77 = arith.constant 0 : index
    %131 = tpu.strided_load %arg25[%c12, %c0_77] {strides = array<i32: 2, 1>} : memref<68x128xf32, #tpu.memory_space<vmem>>, vector<4x128xf32>
    %132 = tpu.concatenate %130, %131 in 0 : vector<4x128xf32>, vector<4x128xf32> -> vector<8x128xf32>
    %c3_78 = arith.constant 3 : index
    %c0_79 = arith.constant 0 : index
    %133 = tpu.strided_load %arg25[%c3_78, %c0_79] {strides = array<i32: 2, 1>} : memref<68x128xf32, #tpu.memory_space<vmem>>, vector<4x128xf32>
    %c13 = arith.constant 13 : index
    %c0_80 = arith.constant 0 : index
    %134 = tpu.strided_load %arg25[%c13, %c0_80] {strides = array<i32: 2, 1>} : memref<68x128xf32, #tpu.memory_space<vmem>>, vector<4x128xf32>
    %135 = tpu.concatenate %133, %134 in 0 : vector<4x128xf32>, vector<4x128xf32> -> vector<8x128xf32>
    %136 = tpu.concatenate %126, %129, %132, %135 in 1 : vector<8x128xf32>, vector<8x128xf32>, vector<8x128xf32>, vector<8x128xf32> -> vector<8x512xf32>
    %137 = arith.truncf %136 : vector<8x512xf32> to vector<8x512xbf16>
    %c0_81 = arith.constant 0 : index
    %c0_82 = arith.constant 0 : index
    %138 = vector.load %arg12[%c0_81, %c0_82] : memref<512x128xbf16, #tpu.memory_space<vmem>>, vector<512x128xbf16>
    %cst_83 = arith.constant dense<0.000000e+00> : vector<8x128xf32>
    %139 = tpu.matmul %137, %138, %cst_83 {dimension_numbers = #tpu.dot_dimension_numbers<[1], [0], [0], [1], [0, 0, 1, 1], [], []>} : vector<8x512xbf16>, vector<512x128xbf16>, vector<8x128xf32> -> vector<8x128xf32>
    %cst_84 = arith.constant dense<0.000000e+00> : vector<128xf32>
    %140 = vector.multi_reduction <add>, %139, %cst_84 [0] : vector<8x128xf32> to vector<128xf32>
    %141 = vector.shape_cast %140 : vector<128xf32> to vector<1x128xf32>
    %142 = arith.mulf %139, %139 : vector<8x128xf32>
    %cst_85 = arith.constant dense<0.000000e+00> : vector<128xf32>
    %143 = vector.multi_reduction <add>, %142, %cst_85 [0] : vector<8x128xf32> to vector<128xf32>
    %144 = vector.shape_cast %143 : vector<128xf32> to vector<1x128xf32>
    %145 = tpu.concatenate %141, %144 in 0 : vector<1x128xf32>, vector<1x128xf32> -> vector<2x128xf32>
    %c0_86 = arith.constant 0 : index
    %c0_87 = arith.constant 0 : index
    %146 = vector.load %arg13[%c0_86, %c0_87] : memref<128x32xf32, #tpu.memory_space<vmem>>, vector<128x32xf32>
    %cst_88 = arith.constant dense<0.000000e+00> : vector<2x32xf32>
    %147 = tpu.matmul %145, %146, %cst_88 {dimension_numbers = #tpu.dot_dimension_numbers<[1], [0], [0], [1], [0, 0, 1, 1], [], []>} : vector<2x128xf32>, vector<128x32xf32>, vector<2x32xf32> -> vector<2x32xf32>
    %148 = vector.extract_strided_slice %147 {offsets = [0, 0], sizes = [1, 32], strides = [1, 1]} : vector<2x32xf32> to vector<1x32xf32>
    %cst_89 = arith.constant 3.125000e-02 : f32
    %149 = vector.broadcast %cst_89 : f32 to vector<1x32xf32>
    %150 = arith.mulf %148, %149 : vector<1x32xf32>
    %151 = vector.extract_strided_slice %147 {offsets = [1, 0], sizes = [1, 32], strides = [1, 1]} : vector<2x32xf32> to vector<1x32xf32>
    %cst_90 = arith.constant 3.125000e-02 : f32
    %152 = vector.broadcast %cst_90 : f32 to vector<1x32xf32>
    %153 = arith.mulf %151, %152 : vector<1x32xf32>
    %154 = arith.mulf %150, %150 : vector<1x32xf32>
    %155 = arith.subf %153, %154 : vector<1x32xf32>
    %c0_91 = arith.constant 0 : index
    %c0_92 = arith.constant 0 : index
    %156 = vector.load %arg15[%c0_91, %c0_92] : memref<1x32xf32, #tpu.memory_space<vmem>>, vector<1x32xf32>
    %cst_93 = arith.constant 9.99999974E-6 : f32
    %157 = vector.broadcast %cst_93 : f32 to vector<1x32xf32>
    %158 = arith.addf %155, %157 : vector<1x32xf32>
    %159 = math.rsqrt %158 : vector<1x32xf32>
    %160 = arith.mulf %156, %159 : vector<1x32xf32>
    %c0_94 = arith.constant 0 : index
    %c0_95 = arith.constant 0 : index
    %161 = vector.load %arg16[%c0_94, %c0_95] : memref<1x32xf32, #tpu.memory_space<vmem>>, vector<1x32xf32>
    %162 = arith.mulf %150, %160 : vector<1x32xf32>
    %163 = arith.subf %161, %162 : vector<1x32xf32>
    %164 = tpu.concatenate %160, %163 in 0 : vector<1x32xf32>, vector<1x32xf32> -> vector<2x32xf32>
    %c0_96 = arith.constant 0 : index
    %c0_97 = arith.constant 0 : index
    %165 = vector.load %arg14[%c0_96, %c0_97] : memref<32x128xf32, #tpu.memory_space<vmem>>, vector<32x128xf32>
    %cst_98 = arith.constant dense<0.000000e+00> : vector<2x128xf32>
    %166 = tpu.matmul %164, %165, %cst_98 {dimension_numbers = #tpu.dot_dimension_numbers<[1], [0], [0], [1], [0, 0, 1, 1], [], []>} : vector<2x32xf32>, vector<32x128xf32>, vector<2x128xf32> -> vector<2x128xf32>
    %167 = vector.extract_strided_slice %166 {offsets = [0, 0], sizes = [1, 128], strides = [1, 1]} : vector<2x128xf32> to vector<1x128xf32>
    %168 = vector.broadcast %167 : vector<1x128xf32> to vector<8x128xf32>
    %169 = arith.mulf %139, %168 : vector<8x128xf32>
    %170 = vector.extract_strided_slice %166 {offsets = [1, 0], sizes = [1, 128], strides = [1, 1]} : vector<2x128xf32> to vector<1x128xf32>
    %171 = vector.broadcast %170 : vector<1x128xf32> to vector<8x128xf32>
    %172 = arith.addf %169, %171 : vector<8x128xf32>
    %cst_99 = arith.constant 0.000000e+00 : f32
    %173 = vector.broadcast %cst_99 : f32 to vector<8x128xf32>
    %174 = arith.cmpf oge, %172, %173 : vector<8x128xf32>
    %cst_100 = arith.constant 2.000000e-01 : f32
    %175 = vector.broadcast %cst_100 : f32 to vector<8x128xf32>
    %176 = arith.mulf %175, %172 : vector<8x128xf32>
    %177 = arith.select %174, %172, %176 : vector<8x128xi1>, vector<8x128xf32>
    %178 = vector.extract_strided_slice %177 {offsets = [0, 0], sizes = [4, 128], strides = [1, 1]} : vector<8x128xf32> to vector<4x128xf32>
    %179 = vector.extract_strided_slice %177 {offsets = [4, 0], sizes = [4, 128], strides = [1, 1]} : vector<8x128xf32> to vector<4x128xf32>
    %180 = tpu.concatenate %0, %178, %0, %0, %179, %0 in 0 : vector<1x128xf32>, vector<4x128xf32>, vector<1x128xf32>, vector<1x128xf32>, vector<4x128xf32>, vector<1x128xf32> -> vector<12x128xf32>
    %c0_101 = arith.constant 0 : index
    %c0_102 = arith.constant 0 : index
    %181 = vector.load %arg25[%c0_101, %c0_102] : memref<68x128xf32, #tpu.memory_space<vmem>>, vector<12x128xf32>
    tpu.vector_store %arg25[%c0_101, %c0_102], %180 {strides = array<i32>} : memref<68x128xf32, #tpu.memory_space<vmem>>, vector<12x128xf32>,
    %c0_103 = arith.constant 0 : index
    %c0_104 = arith.constant 0 : index
    %182 = tpu.strided_load %arg25[%c0_103, %c0_104] {strides = array<i32: 2, 1>} : memref<68x128xf32, #tpu.memory_space<vmem>>, vector<2x128xf32>
    %c6 = arith.constant 6 : index
    %c0_105 = arith.constant 0 : index
    %183 = tpu.strided_load %arg25[%c6, %c0_105] {strides = array<i32: 2, 1>} : memref<68x128xf32, #tpu.memory_space<vmem>>, vector<2x128xf32>
    %184 = tpu.concatenate %182, %183 in 0 : vector<2x128xf32>, vector<2x128xf32> -> vector<4x128xf32>
    %c1_106 = arith.constant 1 : index
    %c0_107 = arith.constant 0 : index
    %185 = tpu.strided_load %arg25[%c1_106, %c0_107] {strides = array<i32: 2, 1>} : memref<68x128xf32, #tpu.memory_space<vmem>>, vector<2x128xf32>
    %c7 = arith.constant 7 : index
    %c0_108 = arith.constant 0 : index
    %186 = tpu.strided_load %arg25[%c7, %c0_108] {strides = array<i32: 2, 1>} : memref<68x128xf32, #tpu.memory_space<vmem>>, vector<2x128xf32>
    %187 = tpu.concatenate %185, %186 in 0 : vector<2x128xf32>, vector<2x128xf32> -> vector<4x128xf32>
    %c2_109 = arith.constant 2 : index
    %c0_110 = arith.constant 0 : index
    %188 = tpu.strided_load %arg25[%c2_109, %c0_110] {strides = array<i32: 2, 1>} : memref<68x128xf32, #tpu.memory_space<vmem>>, vector<2x128xf32>
    %c8 = arith.constant 8 : index
    %c0_111 = arith.constant 0 : index
    %189 = tpu.strided_load %arg25[%c8, %c0_111] {strides = array<i32: 2, 1>} : memref<68x128xf32, #tpu.memory_space<vmem>>, vector<2x128xf32>
    %190 = tpu.concatenate %188, %189 in 0 : vector<2x128xf32>, vector<2x128xf32> -> vector<4x128xf32>
    %c3_112 = arith.constant 3 : index
    %c0_113 = arith.constant 0 : index
    %191 = tpu.strided_load %arg25[%c3_112, %c0_113] {strides = array<i32: 2, 1>} : memref<68x128xf32, #tpu.memory_space<vmem>>, vector<2x128xf32>
    %c9 = arith.constant 9 : index
    %c0_114 = arith.constant 0 : index
    %192 = tpu.strided_load %arg25[%c9, %c0_114] {strides = array<i32: 2, 1>} : memref<68x128xf32, #tpu.memory_space<vmem>>, vector<2x128xf32>
    %193 = tpu.concatenate %191, %192 in 0 : vector<2x128xf32>, vector<2x128xf32> -> vector<4x128xf32>
    %194 = tpu.concatenate %184, %187, %190, %193 in 1 : vector<4x128xf32>, vector<4x128xf32>, vector<4x128xf32>, vector<4x128xf32> -> vector<4x512xf32>
    %195 = arith.truncf %194 : vector<4x512xf32> to vector<4x512xbf16>
    %c0_115 = arith.constant 0 : index
    %c0_116 = arith.constant 0 : index
    %196 = vector.load %arg17[%c0_115, %c0_116] : memref<512x128xbf16, #tpu.memory_space<vmem>>, vector<512x128xbf16>
    %cst_117 = arith.constant dense<0.000000e+00> : vector<4x128xf32>
    %197 = tpu.matmul %195, %196, %cst_117 {dimension_numbers = #tpu.dot_dimension_numbers<[1], [0], [0], [1], [0, 0, 1, 1], [], []>} : vector<4x512xbf16>, vector<512x128xbf16>, vector<4x128xf32> -> vector<4x128xf32>
    %cst_118 = arith.constant dense<0.000000e+00> : vector<128xf32>
    %198 = vector.multi_reduction <add>, %197, %cst_118 [0] : vector<4x128xf32> to vector<128xf32>
    %199 = vector.shape_cast %198 : vector<128xf32> to vector<1x128xf32>
    %200 = arith.mulf %197, %197 : vector<4x128xf32>
    %cst_119 = arith.constant dense<0.000000e+00> : vector<128xf32>
    %201 = vector.multi_reduction <add>, %200, %cst_119 [0] : vector<4x128xf32> to vector<128xf32>
    %202 = vector.shape_cast %201 : vector<128xf32> to vector<1x128xf32>
    %203 = tpu.concatenate %199, %202 in 0 : vector<1x128xf32>, vector<1x128xf32> -> vector<2x128xf32>
    %c0_120 = arith.constant 0 : index
    %c0_121 = arith.constant 0 : index
    %204 = vector.load %arg18[%c0_120, %c0_121] : memref<128x64xf32, #tpu.memory_space<vmem>>, vector<128x64xf32>
    %cst_122 = arith.constant dense<0.000000e+00> : vector<2x64xf32>
    %205 = tpu.matmul %203, %204, %cst_122 {dimension_numbers = #tpu.dot_dimension_numbers<[1], [0], [0], [1], [0, 0, 1, 1], [], []>} : vector<2x128xf32>, vector<128x64xf32>, vector<2x64xf32> -> vector<2x64xf32>
    %206 = vector.extract_strided_slice %205 {offsets = [0, 0], sizes = [1, 64], strides = [1, 1]} : vector<2x64xf32> to vector<1x64xf32>
    %cst_123 = arith.constant 1.250000e-01 : f32
    %207 = vector.broadcast %cst_123 : f32 to vector<1x64xf32>
    %208 = arith.mulf %206, %207 : vector<1x64xf32>
    %209 = vector.extract_strided_slice %205 {offsets = [1, 0], sizes = [1, 64], strides = [1, 1]} : vector<2x64xf32> to vector<1x64xf32>
    %cst_124 = arith.constant 1.250000e-01 : f32
    %210 = vector.broadcast %cst_124 : f32 to vector<1x64xf32>
    %211 = arith.mulf %209, %210 : vector<1x64xf32>
    %212 = arith.mulf %208, %208 : vector<1x64xf32>
    %213 = arith.subf %211, %212 : vector<1x64xf32>
    %c0_125 = arith.constant 0 : index
    %c0_126 = arith.constant 0 : index
    %214 = vector.load %arg20[%c0_125, %c0_126] : memref<1x64xf32, #tpu.memory_space<vmem>>, vector<1x64xf32>
    %cst_127 = arith.constant 9.99999974E-6 : f32
    %215 = vector.broadcast %cst_127 : f32 to vector<1x64xf32>
    %216 = arith.addf %213, %215 : vector<1x64xf32>
    %217 = math.rsqrt %216 : vector<1x64xf32>
    %218 = arith.mulf %214, %217 : vector<1x64xf32>
    %c0_128 = arith.constant 0 : index
    %c0_129 = arith.constant 0 : index
    %219 = vector.load %arg21[%c0_128, %c0_129] : memref<1x64xf32, #tpu.memory_space<vmem>>, vector<1x64xf32>
    %220 = arith.mulf %208, %218 : vector<1x64xf32>
    %221 = arith.subf %219, %220 : vector<1x64xf32>
    %222 = tpu.concatenate %218, %221 in 0 : vector<1x64xf32>, vector<1x64xf32> -> vector<2x64xf32>
    %c0_130 = arith.constant 0 : index
    %c0_131 = arith.constant 0 : index
    %223 = vector.load %arg19[%c0_130, %c0_131] : memref<64x128xf32, #tpu.memory_space<vmem>>, vector<64x128xf32>
    %cst_132 = arith.constant dense<0.000000e+00> : vector<2x128xf32>
    %224 = tpu.matmul %222, %223, %cst_132 {dimension_numbers = #tpu.dot_dimension_numbers<[1], [0], [0], [1], [0, 0, 1, 1], [], []>} : vector<2x64xf32>, vector<64x128xf32>, vector<2x128xf32> -> vector<2x128xf32>
    %225 = vector.extract_strided_slice %224 {offsets = [0, 0], sizes = [1, 128], strides = [1, 1]} : vector<2x128xf32> to vector<1x128xf32>
    %226 = vector.broadcast %225 : vector<1x128xf32> to vector<4x128xf32>
    %227 = arith.mulf %197, %226 : vector<4x128xf32>
    %228 = vector.extract_strided_slice %224 {offsets = [1, 0], sizes = [1, 128], strides = [1, 1]} : vector<2x128xf32> to vector<1x128xf32>
    %229 = vector.broadcast %228 : vector<1x128xf32> to vector<4x128xf32>
    %230 = arith.addf %227, %229 : vector<4x128xf32>
    %cst_133 = arith.constant 0.000000e+00 : f32
    %231 = vector.broadcast %cst_133 : f32 to vector<4x128xf32>
    %232 = arith.cmpf oge, %230, %231 : vector<4x128xf32>
    %cst_134 = arith.constant 2.000000e-01 : f32
    %233 = vector.broadcast %cst_134 : f32 to vector<4x128xf32>
    %234 = arith.mulf %233, %230 : vector<4x128xf32>
    %235 = arith.select %232, %230, %234 : vector<4x128xi1>, vector<4x128xf32>
    %236 = vector.extract_strided_slice %235 {offsets = [0, 0], sizes = [1, 128], strides = [1, 1]} : vector<4x128xf32> to vector<1x128xf32>
    %237 = vector.extract_strided_slice %235 {offsets = [1, 0], sizes = [1, 128], strides = [1, 1]} : vector<4x128xf32> to vector<1x128xf32>
    %238 = tpu.concatenate %236, %237 in 1 : vector<1x128xf32>, vector<1x128xf32> -> vector<1x256xf32>
    %239 = vector.extract_strided_slice %235 {offsets = [2, 0], sizes = [1, 128], strides = [1, 1]} : vector<4x128xf32> to vector<1x128xf32>
    %240 = vector.extract_strided_slice %235 {offsets = [3, 0], sizes = [1, 128], strides = [1, 1]} : vector<4x128xf32> to vector<1x128xf32>
    %241 = tpu.concatenate %239, %240 in 1 : vector<1x128xf32>, vector<1x128xf32> -> vector<1x256xf32>
    %242 = tpu.concatenate %238, %241 in 0 : vector<1x256xf32>, vector<1x256xf32> -> vector<2x256xf32>
    %243 = arith.truncf %242 : vector<2x256xf32> to vector<2x256xbf16>
    %c0_135 = arith.constant 0 : index
    %c0_136 = arith.constant 0 : index
    %244 = vector.load %arg22[%c0_135, %c0_136] : memref<256x128xbf16, #tpu.memory_space<vmem>>, vector<256x128xbf16>
    %cst_137 = arith.constant dense<0.000000e+00> : vector<2x128xf32>
    %245 = tpu.matmul %243, %244, %cst_137 {dimension_numbers = #tpu.dot_dimension_numbers<[1], [0], [0], [1], [0, 0, 1, 1], [], []>} : vector<2x256xbf16>, vector<256x128xbf16>, vector<2x128xf32> -> vector<2x128xf32>
    %c0_138 = arith.constant 0 : index
    %c0_139 = arith.constant 0 : index
    %246 = vector.load %arg23[%c0_138, %c0_139] : memref<1x128xf32, #tpu.memory_space<vmem>>, vector<1x128xf32>
    %247 = vector.broadcast %246 : vector<1x128xf32> to vector<2x128xf32>
    %248 = arith.addf %245, %247 : vector<2x128xf32>
    %cst_140 = arith.constant 0.000000e+00 : f32
    %249 = vector.broadcast %cst_140 : f32 to vector<2x128xf32>
    %250 = arith.maximumf %248, %249 : vector<2x128xf32>
    %c0_141 = arith.constant 0 : index
    %c0_142 = arith.constant 0 : index
    %251 = vector.load %arg24[%c0_141, %c0_142] : memref<2x128xf32, #tpu.memory_space<vmem>>, vector<2x128xf32>
    tpu.vector_store %arg24[%c0_141, %c0_142], %250 {strides = array<i32>} : memref<2x128xf32, #tpu.memory_space<vmem>>, vector<2x128xf32>,
    return
  }
  func.func @transform_0(%arg0: i32) -> (i32, i32) {
    %c0_i32 = arith.constant 0 : i32
    %c0_i32_0 = arith.constant 0 : i32
    %c0_i32_1 = arith.constant 0 : i32
    return %c0_i32, %c0_i32_0 : i32, i32
  }
  func.func @transform_1(%arg0: i32) -> (i32, i32) {
    %c0_i32 = arith.constant 0 : i32
    %c0_i32_0 = arith.constant 0 : i32
    %c0_i32_1 = arith.constant 0 : i32
    return %c0_i32, %c0_i32_0 : i32, i32
  }
  func.func @transform_2(%arg0: i32) -> (i32, i32) {
    %c0_i32 = arith.constant 0 : i32
    %c0_i32_0 = arith.constant 0 : i32
    %c0_i32_1 = arith.constant 0 : i32
    return %c0_i32, %c0_i32_0 : i32, i32
  }
  func.func @transform_3(%arg0: i32) -> (i32, i32) {
    %c0_i32 = arith.constant 0 : i32
    %c0_i32_0 = arith.constant 0 : i32
    %c0_i32_1 = arith.constant 0 : i32
    return %c0_i32, %c0_i32_0 : i32, i32
  }
  func.func @transform_4(%arg0: i32) -> (i32, i32) {
    %c0_i32 = arith.constant 0 : i32
    %c0_i32_0 = arith.constant 0 : i32
    %c0_i32_1 = arith.constant 0 : i32
    return %c0_i32, %c0_i32_0 : i32, i32
  }
  func.func @transform_5(%arg0: i32) -> (i32, i32) {
    %c0_i32 = arith.constant 0 : i32
    %c0_i32_0 = arith.constant 0 : i32
    %c0_i32_1 = arith.constant 0 : i32
    return %c0_i32, %c0_i32_0 : i32, i32
  }
  func.func @transform_6(%arg0: i32) -> (i32, i32) {
    %c0_i32 = arith.constant 0 : i32
    %c0_i32_0 = arith.constant 0 : i32
    %c0_i32_1 = arith.constant 0 : i32
    return %c0_i32, %c0_i32_0 : i32, i32
  }
  func.func @transform_7(%arg0: i32) -> (i32, i32) {
    %c0_i32 = arith.constant 0 : i32
    %c0_i32_0 = arith.constant 0 : i32
    %c0_i32_1 = arith.constant 0 : i32
    return %c0_i32, %c0_i32_0 : i32, i32
  }
  func.func @transform_8(%arg0: i32) -> (i32, i32) {
    %c0_i32 = arith.constant 0 : i32
    %c0_i32_0 = arith.constant 0 : i32
    %c0_i32_1 = arith.constant 0 : i32
    return %c0_i32, %c0_i32_0 : i32, i32
  }
  func.func @transform_9(%arg0: i32) -> (i32, i32) {
    %c0_i32 = arith.constant 0 : i32
    %c0_i32_0 = arith.constant 0 : i32
    %c0_i32_1 = arith.constant 0 : i32
    return %c0_i32, %c0_i32_0 : i32, i32
  }
  func.func @transform_10(%arg0: i32) -> (i32, i32) {
    %c0_i32 = arith.constant 0 : i32
    %c0_i32_0 = arith.constant 0 : i32
    %c0_i32_1 = arith.constant 0 : i32
    return %c0_i32, %c0_i32_0 : i32, i32
  }
  func.func @transform_11(%arg0: i32) -> (i32, i32) {
    %c0_i32 = arith.constant 0 : i32
    %c0_i32_0 = arith.constant 0 : i32
    %c0_i32_1 = arith.constant 0 : i32
    return %c0_i32, %c0_i32_0 : i32, i32
  }
  func.func @transform_12(%arg0: i32) -> (i32, i32) {
    %c0_i32 = arith.constant 0 : i32
    %c0_i32_0 = arith.constant 0 : i32
    %c0_i32_1 = arith.constant 0 : i32
    return %c0_i32, %c0_i32_0 : i32, i32
  }
  func.func @transform_13(%arg0: i32) -> (i32, i32) {
    %c0_i32 = arith.constant 0 : i32
    %c0_i32_0 = arith.constant 0 : i32
    %c0_i32_1 = arith.constant 0 : i32
    return %c0_i32, %c0_i32_0 : i32, i32
  }
  func.func @transform_14(%arg0: i32) -> (i32, i32) {
    %c0_i32 = arith.constant 0 : i32
    %c0_i32_0 = arith.constant 0 : i32
    %c0_i32_1 = arith.constant 0 : i32
    return %c0_i32, %c0_i32_0 : i32, i32
  }
  func.func @transform_15(%arg0: i32) -> (i32, i32) {
    %c0_i32 = arith.constant 0 : i32
    %c0_i32_0 = arith.constant 0 : i32
    %c0_i32_1 = arith.constant 0 : i32
    return %c0_i32, %c0_i32_0 : i32, i32
  }
  func.func @transform_16(%arg0: i32) -> (i32, i32) {
    %c0_i32 = arith.constant 0 : i32
    %c0_i32_0 = arith.constant 0 : i32
    %c0_i32_1 = arith.constant 0 : i32
    return %c0_i32, %c0_i32_0 : i32, i32
  }
  func.func @transform_17(%arg0: i32) -> (i32, i32) {
    %c0_i32 = arith.constant 0 : i32
    %c0_i32_0 = arith.constant 0 : i32
    %c0_i32_1 = arith.constant 0 : i32
    return %c0_i32, %c0_i32_0 : i32, i32
  }
  func.func @transform_18(%arg0: i32) -> (i32, i32) {
    %c0_i32 = arith.constant 0 : i32
    %c0_i32_0 = arith.constant 0 : i32
    %c0_i32_1 = arith.constant 0 : i32
    return %c0_i32, %c0_i32_0 : i32, i32
  }
  func.func @transform_19(%arg0: i32) -> (i32, i32) {
    %c0_i32 = arith.constant 0 : i32
    %c0_i32_0 = arith.constant 0 : i32
    %c0_i32_1 = arith.constant 0 : i32
    return %c0_i32, %c0_i32_0 : i32, i32
  }
  func.func @transform_20(%arg0: i32) -> (i32, i32) {
    %c0_i32 = arith.constant 0 : i32
    %c0_i32_0 = arith.constant 0 : i32
    %c0_i32_1 = arith.constant 0 : i32
    return %c0_i32, %c0_i32_0 : i32, i32
  }
  func.func @transform_21(%arg0: i32) -> (i32, i32) {
    %c0_i32 = arith.constant 0 : i32
    %c0_i32_0 = arith.constant 0 : i32
    %c0_i32_1 = arith.constant 0 : i32
    return %c0_i32, %c0_i32_0 : i32, i32
  }
  func.func @transform_22(%arg0: i32) -> (i32, i32) {
    %c0_i32 = arith.constant 0 : i32
    %c0_i32_0 = arith.constant 0 : i32
    %c0_i32_1 = arith.constant 0 : i32
    return %c0_i32, %c0_i32_0 : i32, i32
  }
  func.func @transform_23(%arg0: i32) -> (i32, i32) {
    %c0_i32 = arith.constant 0 : i32
    %c0_i32_0 = arith.constant 0 : i32
    %c0_i32_1 = arith.constant 0 : i32
    return %c0_i32, %c0_i32_0 : i32, i32
  }
}

</mosaic_0001>

<bundles_post_ra>
// kernel: vae_encoder_forward.1
= control target key start
LH: loop header
LB: loop body
LE: loop exit
PB: predicated region body
PF: predicated region fallthrough
CT: control target
= control target key end

     0   :  { %s4796_s0 = inlined_call_operand.vmem [shape: f32[64,96], index: 0, kind: input, shape index: {}]   ;;  %s4797_s1 = inlined_call_operand.vmem [shape: bf16[512,128], index: 1, kind: input, shape index: {}]   ;;  %s4798_s2 = inlined_call_operand.vmem [shape: f32[128,8], index: 2, kind: input, shape index: {}]   ;;  %s4799_s3 = inlined_call_operand.vmem [shape: f32[8,128], index: 3, kind: input, shape index: {}]   ;;  %s4800_s4 = inlined_call_operand.vmem [shape: f32[1,8], index: 4, kind: input, shape index: {}]   ;;  %s4801_s5 = inlined_call_operand.vmem [shape: f32[1,8], index: 5, kind: input, shape index: {}]   ;;  %s4802_s6 = inlined_call_operand.vmem [shape: bf16[512,128], index: 6, kind: input, shape index: {}]   ;;  %s4803_s7 = inlined_call_operand.vmem [shape: f32[128,16], index: 7, kind: input, shape index: {}]   ;;  %s4804_s8 = inlined_call_operand.vmem [shape: f32[16,128], index: 8, kind: input, shape index: {}]   ;;  %s4805_s9 = inlined_call_operand.vmem [shape: f32[1,16], index: 9, kind: input, shape index: {}]   ;;  %s4806_s10 = inlined_call_operand.vmem [shape: f32[1,16], index: 10, kind: input, shape index: {}]   ;;  %s4807_s11 = inlined_call_operand.vmem [shape: bf16[512,128], index: 11, kind: input, shape index: {}]   ;;  %s4808_s12 = inlined_call_operand.vmem [shape: f32[128,32], index: 12, kind: input, shape index: {}]   ;;  %s4809_s13 = inlined_call_operand.vmem [shape: f32[32,128], index: 13, kind: input, shape index: {}]   ;;  %s4810_s14 = inlined_call_operand.vmem [shape: f32[1,32], index: 14, kind: input, shape index: {}]   ;;  %s4811_s15 = inlined_call_operand.vmem [shape: f32[1,32], index: 15, kind: input, shape index: {}]   ;;  %s4812_s16 = inlined_call_operand.vmem [shape: bf16[512,128], index: 16, kind: input, shape index: {}]   ;;  %s4813_s17 = inlined_call_operand.vmem [shape: f32[128,64], index: 17, kind: input, shape index: {}]   ;;  %s4814_s18 = inlined_call_operand.vmem [shape: f32[64,128], index: 18, kind: input, shape index: {}]   ;;  %s4815_s19 = inlined_call_operand.vmem [shape: f32[1,64], index: 19, kind: input, shape index: {}]   ;;  %s4816_s20 = inlined_call_operand.vmem [shape: f32[1,64], index: 20, kind: input, shape index: {}]   ;;  %s4817_s21 = inlined_call_operand.vmem [shape: bf16[256,128], index: 21, kind: input, shape index: {}]   ;;  %s4818_s22 = inlined_call_operand.vmem [shape: f32[1,128], index: 22, kind: input, shape index: {}]   ;;  %s4819_s23 = inlined_call_operand.hbm [shape: f32[2,128], index: 23, kind: output, shape index: {}]  }
   0x1   :  { %4825 = sst [smem:[#allocation6_spill]] %s4796_s0 }
   0x2   :  { %4826 = sst [smem:[#allocation7_spill]] %s4797_s1 }
   0x3   :  { %4827 = sst [smem:[#allocation8_spill]] %s4798_s2 }
   0x4   :  { %4828 = sst [smem:[#allocation9_spill]] %s4799_s3 }
   0x5   :  { %4829 = sst [smem:[#allocation10_spill]] %s4800_s4 }
   0x6   :  { %4830 = sst [smem:[#allocation11_spill]] %s4801_s5 }
   0x7   :  { %4831 = sst [smem:[#allocation12_spill]] %s4802_s6 }
   0x8   :  { %4832 = sst [smem:[#allocation13_spill]] %s4803_s7 }
   0x9   :  { %s4833_s24 = sld [smem:[#allocation7_spill]]  ;;  %vm84_vm0 = vcmask 785408   ;;  %s4834_s28 = sld [smem:[#allocation6_spill]]  ;;  %vm97_vm1 = vcmask 1040384   ;;  %vm114_vm2 = vcmask 1042432   ;;  %vm129_vm3 = vcmask 1041408  }
   0xf   :  { %v3574_v0 = vld [vmem:[%s4833_s24 + $0x40] sm:$0xff]   ;;  %v3578_v4 = vld [vmem:[%s4833_s24 + $0x48] sm:$0xff]   ;;  %v3582_v8 = vld [vmem:[%s4833_s24 + $0x50] sm:$0xff]  }
  0x10   :  { %v3575_v1 = vld [vmem:[%s4833_s24 + $0xc0] sm:$0xff]   ;;  %2973 = vmatprep.subr.bf16.mxu0 %v3574_v0  ;;  %v3579_v5 = vld [vmem:[%s4833_s24 + $0xc8] sm:$0xff]   ;;  %v3583_v9 = vld [vmem:[%s4833_s24 + $0xd0] sm:$0xff]  }
  0x11   :  { %v3576_v2 = vld [vmem:[%s4833_s24] sm:$0xff]   ;;  %3001 = vmatprep.subr.bf16.mxu1 %v3575_v1  ;;  %v3580_v6 = vld [vmem:[%s4833_s24 + $0x8] sm:$0xff]   ;;  %v3584_v10 = vld [vmem:[%s4833_s24 + $0x10] sm:$0xff]  }
  0x12   :  { %v3577_v3 = vld [vmem:[%s4833_s24 + $0x80] sm:$0xff]   ;;  %2974 = vmatpush3.bf16.msra.mxu0 %v3576_v2  ;;  %v3581_v7 = vld [vmem:[%s4833_s24 + $0x88] sm:$0xff]   ;;  %v3585_v11 = vld [vmem:[%s4833_s24 + $0x90] sm:$0xff]  }
  0x13   :  { %3002 = vmatpush3.bf16.msra.mxu1 %v3577_v3  ;;  %2975 = vmatprep.subr.bf16.mxu0 %v3578_v4  ;;  %v3586_v12 = vld [vmem:[%s4833_s24 + $0x58] sm:$0xff]   ;;  %v3590_v16 = vld [vmem:[%s4833_s24 + $0x60] sm:$0xff]   ;;  %v3594_v20 = vld [vmem:[%s4833_s24 + $0x68] sm:$0xff]  }
  0x14   :  { %3003 = vmatprep.subr.bf16.mxu1 %v3579_v5  ;;  %v3587_v13 = vld [vmem:[%s4833_s24 + $0xd8] sm:$0xff]   ;;  %v3591_v17 = vld [vmem:[%s4833_s24 + $0xe0] sm:$0xff]   ;;  %v3595_v21 = vld [vmem:[%s4833_s24 + $0xe8] sm:$0xff]  }
  0x15   :  { %v3588_v14 = vld [vmem:[%s4833_s24 + $0x18] sm:$0xff]   ;;  %v3592_v18 = vld [vmem:[%s4833_s24 + $0x20] sm:$0xff]   ;;  %v3596_v22 = vld [vmem:[%s4833_s24 + $0x28] sm:$0xff]  }
  0x16   :  { %2976 = vmatpush3.bf16.msra.mxu0 %v3580_v6  ;;  %v3589_v15 = vld [vmem:[%s4833_s24 + $0x98] sm:$0xff]   ;;  %v3593_v19 = vld [vmem:[%s4833_s24 + $0xa0] sm:$0xff]   ;;  %v3597_v23 = vld [vmem:[%s4833_s24 + $0xa8] sm:$0xff]  }
  0x17   :  { %3004 = vmatpush3.bf16.msra.mxu1 %v3581_v7  ;;  %2977 = vmatprep.subr.bf16.mxu0 %v3582_v8  ;;  %v3598_v24 = vld [vmem:[%s4833_s24 + $0x70] sm:$0xff]   ;;  %v3602_v28 = vld [vmem:[%s4833_s24 + $0x78] sm:$0xff]   ;;  %v76_v32 = vld [vmem:[%s4834_s28] sm:$0xff] }
  0x18   :  { %3005 = vmatprep.subr.bf16.mxu1 %v3583_v9  ;;  %v3599_v25 = vld [vmem:[%s4833_s24 + $0xf0] sm:$0xff]   ;;  %v3603_v29 = vld [vmem:[%s4833_s24 + $0xf8] sm:$0xff]   ;;  %v77_v33 = vld [vmem:[%s4834_s28 + $0x8] sm:$0xff]  ;;  %v85_v36 = vsel %vm84_vm0, %v76_v32, 0.0 }
  0x19   :  { %v3600_v26 = vld [vmem:[%s4833_s24 + $0x30] sm:$0xff]   ;;  %v3604_v30 = vld [vmem:[%s4833_s24 + $0x38] sm:$0xff]   ;;  %v86_v37 = vsel %vm84_vm0, %v77_v33, 0.0  ;;  %v80_v39 = vld [vmem:[%s4834_s28 + $0x20] sm:$0xff]  ;;  %v98_v42 = vrot.slane %v85_v36, 7 }
  0x1a   :  { %2978 = vmatpush3.bf16.msra.mxu0 %v3584_v10  ;;  %v3601_v27 = vld [vmem:[%s4833_s24 + $0xb0] sm:$0xff]   ;;  %v3605_v31 = vld [vmem:[%s4833_s24 + $0xb8] sm:$0xff]   ;;  %v81_v40 = vld [vmem:[%s4834_s28 + $0x28] sm:$0xff]  ;;  %v99_v43 = vrot.slane %v86_v37, 7  ;;  %v89_v48 = vsel %vm84_vm0, %v80_v39, 0.0 }
  0x1b   :  { %3006 = vmatpush3.bf16.msra.mxu1 %v3585_v11  ;;  %2979 = vmatprep.subr.bf16.mxu0 %v3586_v12  ;;  %v78_v34 = vld [vmem:[%s4834_s28 + $0x10] sm:$0xff]  ;;  %v79_v35 = vld [vmem:[%s4834_s28 + $0x18] sm:$0xff]  ;;  %v90_v49 = vsel %vm84_vm0, %v81_v40, 0.0  ;;  %v127_v53 = vsel %vm97_vm1, 0.0, %v98_v42  ;;  %v115_v54 = vrot.slane %v89_v48, 5 }
  0x1c   :  { %3007 = vmatprep.subr.bf16.mxu1 %v3587_v13  ;;  %v87_v38 = vsel %vm84_vm0, %v78_v34, 0.0  ;;  %v88_v41 = vsel %vm84_vm0, %v79_v35, 0.0  ;;  %v82_v45 = vld [vmem:[%s4834_s28 + $0x30] sm:$0xff]  ;;  %v83_v46 = vld [vmem:[%s4834_s28 + $0x38] sm:$0xff]  ;;  %v100_v51 = vsel %vm97_vm1, %v98_v42, %v99_v43  ;;  %133 = vst [vmem:[#allocation2] sm:$0xff] %v127_v53  ;;  %v116_v58 = vrot.slane %v90_v49, 5 }
  0x1d   :  { %v101_v44 = vrot.slane %v87_v38, 7  ;;  %v103_v47 = vrot.slane %v88_v41, 7  ;;  %v91_v50 = vsel %vm84_vm0, %v82_v45, 0.0  ;;  %134 = vst [vmem:[#allocation2 + $0x8] sm:$0xff] %v100_v51  ;;  %v92_v57 = vsel %vm84_vm0, %v83_v46, 0.0 }
  0x1e   :  { %2980 = vmatpush3.bf16.msra.mxu0 %v3588_v14  ;;  %v118_v60 = vrot.slane %v91_v50, 5  ;;  %v120_v61 = vrot.slane %v92_v57, 5  ;;  %v117_v63 = vsel %vm114_vm2, %v115_v54, %v116_v58 }
  0x1f   :  { %3008 = vmatpush3.bf16.msra.mxu1 %v3589_v15  ;;  %2981 = vmatprep.subr.bf16.mxu0 %v3590_v16  ;;  %v102_v52 = vsel %vm97_vm1, %v99_v43, %v101_v44  ;;  %v104_v55 = vsel %vm97_vm1, %v101_v44, %v103_v47  ;;  %v128_v56 = vsel %vm97_vm1, %v103_v47, 0.0  ;;  %138 = vst [vmem:[#allocation2 + $0x28] sm:$0xff] %v117_v63 }
  0x20   :  { %3009 = vmatprep.subr.bf16.mxu1 %v3591_v17  ;;  %135 = vst [vmem:[#allocation2 + $0x10] sm:$0xff] %v102_v52  ;;  %136 = vst [vmem:[#allocation2 + $0x18] sm:$0xff] %v104_v55  ;;  %v130_v59 = vsel %vm129_vm3, %v128_v56, 0.0  ;;  %v119_v0 = vsel %vm114_vm2, %v116_v58, %v118_v60  ;;  %v121_v1 = vsel %vm114_vm2, %v118_v60, %v120_v61  ;;  %v132_v2 = vsel %vm114_vm2, %v120_v61, 0.0 }
  0x21   :  { %v131_v62 = vsel %vm114_vm2, %v130_v59, %v115_v54  ;;  %139 = vst [vmem:[#allocation2 + $0x30] sm:$0xff] %v119_v0  ;;  %140 = vst [vmem:[#allocation2 + $0x38] sm:$0xff] %v121_v1 }
  0x22   :  { %2982 = vmatpush3.bf16.msra.mxu0 %v3592_v18  ;;  %137 = vst [vmem:[#allocation2 + $0x20] sm:$0xff] %v131_v62  ;;  %141 = vst [vmem:[#allocation2 + $0x40] sm:$0xf] %v132_v2 }
  0x23   :  { %3010 = vmatpush3.bf16.msra.mxu1 %v3593_v19  ;;  %2983 = vmatprep.subr.bf16.mxu0 %v3594_v20 }
  0x24   :  { %3011 = vmatprep.subr.bf16.mxu1 %v3595_v21  ;;  %v150_v3 = vld [vmem:[#allocation2 + $0x1] ss:$2 sm:$0xff]  ;;  %v142_v5 = vld [vmem:[#allocation2] ss:$2 sm:$0xff] }
  0x26   :  { %2984 = vmatpush3.bf16.msra.mxu0 %v3596_v22 }
  0x27   :  { %3012 = vmatpush3.bf16.msra.mxu1 %v3597_v23  ;;  %2985 = vmatprep.subr.bf16.mxu0 %v3598_v24  ;;  %v166_v4 = vld [vmem:[#allocation2 + $0x3] ss:$2 sm:$0xff]  ;;  %v144_v7 = vld [vmem:[#allocation2 + $0x10] ss:$2 sm:$0xff] }
  0x28   :  { %3013 = vmatprep.subr.bf16.mxu1 %v3599_v25  ;;  %v152_v6 = vld [vmem:[#allocation2 + $0x11] ss:$2 sm:$0xff]  ;;  %v158_v8 = vld [vmem:[#allocation2 + $0x2] ss:$2 sm:$0xff]  ;;  %v173_v10 = vpack.c.bf16 %v144_v7, %v142_v5 }
  0x29   :  { %v174_v9 = vpack.c.bf16 %v152_v6, %v150_v3  ;;  %v168_v11 = vld [vmem:[#allocation2 + $0x13] ss:$2 sm:$0xff]  ;;  %v160_v12 = vld [vmem:[#allocation2 + $0x12] ss:$2 sm:$0xff]  ;;  %v154_v15 = vld [vmem:[#allocation2 + $0x23] ss:$2 sm:$0xff] }
  0x2a   :  { %2986 = vmatpush3.bf16.msra.mxu0 %v3600_v26  ;;  %v176_v13 = vpack.c.bf16 %v168_v11, %v166_v4  ;;  %v175_v14 = vpack.c.bf16 %v160_v12, %v158_v8  ;;  %v156_v16 = vld [vmem:[#allocation2 + $0x33] ss:$2 sm:$0xff]  ;;  %v146_v20 = vld [vmem:[#allocation2 + $0x22] ss:$2 sm:$0xff]  ;;  %v148_v21 = vld [vmem:[#allocation2 + $0x32] ss:$2 sm:$0xff] }
  0x2b   :  { %3014 = vmatpush3.bf16.msra.mxu1 %v3601_v27  ;;  %2987 = vmatprep.subr.bf16.mxu0 %v3602_v28  ;;  %v170_v17 = vld [vmem:[#allocation2 + $0x25] ss:$2 sm:$0xff]  ;;  %v178_v18 = vpack.c.bf16 %v156_v16, %v154_v15  ;;  %v172_v19 = vld [vmem:[#allocation2 + $0x35] ss:$2 sm:$0xff]  ;;  %v162_v23 = vld [vmem:[#allocation2 + $0x24] ss:$2 sm:$0xff]  ;;  %v177_v25 = vpack.c.bf16 %v148_v21, %v146_v20 }
  0x2c   :  { %3015 = vmatprep.subr.bf16.mxu1 %v3603_v29  ;;  %469 = vmatprep.mubr.bf16.mxu0 %v174_v9  ;;  %v180_v22 = vpack.c.bf16 %v172_v19, %v170_v17  ;;  %v164_v24 = vld [vmem:[#allocation2 + $0x34] ss:$2 sm:$0xff] }
  0x2d   :  { %518 = vmatprep.mubr.bf16.mxu1 %v176_v13  ;;  %v179_v26 = vpack.c.bf16 %v164_v24, %v162_v23 }
  0x2e   :  { %2988 = vmatpush3.bf16.msra.mxu0 %v3604_v30 }
  0x2f   :  { %3016 = vmatpush3.bf16.msra.mxu1 %v3605_v31 }
  0x31   :  { %470 = vmatmul.mubr.bf16.vlgmr.msra.gmra.mrb[0].mxu0 %v173_v10 }
  0x32   :  { %519 = vmatmul.mubr.bf16.vlgmr.msra.gmra.mrb[0].mxu1 %v175_v14  ;;  %477 = vmatprep.mubr.bf16.mxu0 %v178_v18 }
  0x33   :  { %526 = vmatprep.mubr.bf16.mxu1 %v180_v22 }
  0x39   :  { %478 = vmatmul.mubr.bf16.gmra.mrb[4].mxu0 %v177_v25 }
  0x3a   :  { %527 = vmatmul.mubr.bf16.gmra.mrb[4].mxu1 %v179_v26 }
  0x3b   :  { %28 = vsyncpa [#allocation4], 0  ;;  %s4835_s3 = sld [smem:[#allocation8_spill]]  ;;  %v3750_v30 = vmov 0.0|0.0   ;;  %vm3751_vm4 = vmmov 0   ;;  %v3752_v51 = vmov 0.0  }
  0x3c   :  { %3452 = vmatprep.subr.bf16.mxu1 %v3750_v30  ;;  %3302 = vmatprep.mubr.msk.f32.mxu1 %vm3751_vm4, %v3752_v51  ;;  %s4836_s24 = sld [smem:[#allocation9_spill]]  ;;  %s4837_s1 = sld [smem:[#allocation12_spill]]  ;;  %vm682_vm5 = vcmask 64512   ;;  %vm1304_vm10 = vcmask 130048   ;;  %vm1416_vm13 = vcmask 1043456   ;;  %vm1920_vm14 = vcmask 261120  }
  0x3d   :  { %s4838_s30 = sld [smem:[#allocation10_spill]]  ;;  %s4839_s5 = sld [smem:[#allocation11_spill]]  ;;  %vm2013_vm0 = vcmask 1044480  }
  0x3e   :  { %s3754_s29 = smov [#allocation3]  }
  0x41   :  { %v558_v27 = vld [vmem:[%s4835_s3] sm:$0xff]  ;;  %v559_v28 = vld [vmem:[%s4835_s3 + $0x8] sm:$0xff]  ;;  %v560_v31 = vld [vmem:[%s4835_s3 + $0x10] sm:$0xff] }
  0x42   :  { %v3453_v29 = vpack.c.bf16 %v559_v28, %v558_v27  ;;  %v561_v32 = vld [vmem:[%s4835_s3 + $0x18] sm:$0xff]  ;;  %v562_v34 = vld [vmem:[%s4835_s3 + $0x20] sm:$0xff]  ;;  %v563_v35 = vld [vmem:[%s4835_s3 + $0x28] sm:$0xff] }
  0x43   :  { %v3456_v33 = vpack.c.bf16 %v561_v32, %v560_v31  ;;  %v3459_v36 = vpack.c.bf16 %v563_v35, %v562_v34  ;;  %v564_v37 = vld [vmem:[%s4835_s3 + $0x30] sm:$0xff]  ;;  %v565_v38 = vld [vmem:[%s4835_s3 + $0x38] sm:$0xff]  ;;  %v566_v40 = vld [vmem:[%s4835_s3 + $0x40] sm:$0xff] }
  0x44   :  { %3454 = vmatpush3.bf16.msra.mxu1 %v3453_v29  ;;  %v3462_v39 = vpack.c.bf16 %v565_v38, %v564_v37  ;;  %v567_v41 = vld [vmem:[%s4835_s3 + $0x48] sm:$0xff]  ;;  %v568_v43 = vld [vmem:[%s4835_s3 + $0x50] sm:$0xff]  ;;  %v569_v44 = vld [vmem:[%s4835_s3 + $0x58] sm:$0xff] }
  0x45   :  { %3455 = vmatprep.subr.bf16.mxu1 %v3750_v30  ;;  %v3465_v42 = vpack.c.bf16 %v567_v41, %v566_v40  ;;  %v3468_v45 = vpack.c.bf16 %v569_v44, %v568_v43  ;;  %v570_v46 = vld [vmem:[%s4835_s3 + $0x60] sm:$0xff]  ;;  %v571_v47 = vld [vmem:[%s4835_s3 + $0x68] sm:$0xff]  ;;  %v572_v49 = vld [vmem:[%s4835_s3 + $0x70] sm:$0xff] }
  0x46   :  { %v3471_v48 = vpack.c.bf16 %v571_v47, %v570_v46  ;;  %v573_v50 = vld [vmem:[%s4835_s3 + $0x78] sm:$0xff]  ;;  %v681_v41 = vld [vmem:[%s4836_s24] sm:$0xff]  ;;  %v3613_v46 = vld [vmem:[%s4837_s1 + $0x88] sm:$0xff]  }
  0x47   :  { %v3474_v52 = vpack.c.bf16 %v573_v50, %v572_v49  ;;  %v3607_v43 = vld [vmem:[%s4837_s1 + $0xc0] sm:$0xff]  }
  0x48   :  { %3457 = vmatpush3.bf16.msra.mxu1 %v3456_v33  ;;  %v3609_v44 = vld [vmem:[%s4837_s1 + $0x80] sm:$0xff]   ;;  %3070 = vmatprep.subr.bf16.mxu0 %v3607_v43 }
  0x49   :  { %3458 = vmatprep.subr.bf16.mxu1 %v3750_v30  ;;  %3071 = vmatpush3.bf16.msra.mxu0 %v3609_v44 }
  0x4c   :  { %3460 = vmatpush3.bf16.msra.mxu1 %v3459_v36 }
  0x4d   :  { %3461 = vmatprep.subr.bf16.mxu1 %v3750_v30 }
  0x50   :  { %3463 = vmatpush3.bf16.msra.mxu1 %v3462_v39 }
  0x51   :  { %3464 = vmatprep.subr.bf16.mxu1 %v3750_v30 }
  0x54   :  { %3466 = vmatpush3.bf16.msra.mxu1 %v3465_v42  ;;  %v3606_v42 = vld [vmem:[%s4837_s1 + $0x40] sm:$0xff]  }
  0x55   :  { %3467 = vmatprep.subr.bf16.mxu1 %v3750_v30 }
  0x58   :  { %3469 = vmatpush3.bf16.msra.mxu1 %v3468_v45  ;;  %v3611_v45 = vld [vmem:[%s4837_s1 + $0xc8] sm:$0xff]  }
  0x59   :  { %3470 = vmatprep.subr.bf16.mxu1 %v3750_v30  ;;  %3072 = vmatprep.subr.bf16.mxu0 %v3611_v45 }
  0x5a   :  { %3073 = vmatpush3.bf16.msra.mxu0 %v3613_v46 }
  0x5c   :  { %3472 = vmatpush3.bf16.msra.mxu1 %v3471_v48 }
  0x5d   :  { %3473 = vmatprep.subr.bf16.mxu1 %v3750_v30 }
  0x60   :  { %3475 = vmatpush3.bf16.msra.mxu1 %v3474_v52 }
  0x61   :  { %3305 = vmatprep.subr.mxu1 %v3752_v51 }
 0x104   :  { %v2989_v53 = vpop.f32.mrb[0].mxu0 }
 0x105   :  { %v2990_v54 = vpop.f32.mrb[1].mxu0  ;;  %v3017_v55 = vpop.f32.mrb[0].mxu1 }
 0x106   :  { %v2991_v56 = vadd.f32 %v2990_v54, %v2989_v53  ;;  %v2992_v57 = vpop.f32.mrb[2].mxu0  ;;  %v3018_v58 = vpop.f32.mrb[1].mxu1 }
 0x107   :  { %v2993_v59 = vpop.f32.mrb[3].mxu0  ;;  %v3019_v60 = vadd.f32 %v3018_v58, %v3017_v55  ;;  %v3020_v61 = vpop.f32.mrb[2].mxu1  ;;  %v3753_v55 = vmov 1966171168  }
 0x108   :  { %v2994_v62 = vadd.f32 %v2993_v59, %v2992_v57  ;;  %v3021_v63 = vpop.f32.mrb[3].mxu1  ;;  %v657_v57 = vlaneseq }
 0x109   :  { %v4073_v0 = vadd.f32 %v3019_v60, %v2991_v56  ;;  %v3022_v1 = vadd.f32 %v3021_v63, %v3020_v61  ;;  %v655_v56 = vunpack.c.l.s4 %v3753_v55 }
 0x10a   :  { %v4114_v59 = vshrl.u32 %v657_v57, 7 }
 0x10b   :  { %v4075_v2 = vadd.f32 %v3022_v1, %v2994_v62  ;;  %v544_v15 = vmul.f32 %v4073_v0, %v4073_v0  ;;  %v656_v58 = vunpack.c.0.s8 %v655_v56  ;;  %v650_v1 = vld [vmem:[%s4838_s30] sm:$0x1] }
 0x10c   :  { %v2995_v3 = vpop.f32.mrb[4].mxu0 }
 0x10d   :  { %v2996_v4 = vpop.f32.mrb[5].mxu0  ;;  %v3023_v5 = vpop.f32.mrb[4].mxu1  ;;  %v545_v10 = vmul.f32 %v4075_v2, %v4075_v2  ;;  %v535_v16 = vadd.f32 %v4075_v2, %v4073_v0  ;;  %v4117_v60 = vsub.s32 %v656_v58, %v4114_v59 }
 0x10e   :  { %v2997_v6 = vadd.f32 %v2996_v4, %v2995_v3  ;;  %v2998_v7 = vpop.f32.mrb[6].mxu0  ;;  %v3024_v8 = vpop.f32.mrb[5].mxu1 }
 0x10f   :  { %v2999_v9 = vpop.f32.mrb[7].mxu0  ;;  %v3025_v11 = vadd.f32 %v3024_v8, %v3023_v5  ;;  %v3026_v12 = vpop.f32.mrb[6].mxu1  ;;  %v548_v19 = vadd.f32 %v545_v10, %v544_v15  ;;  %v671_v5 = vld [vmem:[%s4839_s5] sm:$0x1]  ;;  %v3615_v15 = vld [vmem:[%s4837_s1 + $0xd0] sm:$0xff]   ;;  %s4840_s5 = sld [smem:[#allocation13_spill]] }
 0x110   :  { %v3000_v13 = vadd.f32 %v2999_v9, %v2998_v7  ;;  %v3027_v14 = vpop.f32.mrb[7].mxu1  ;;  %v4128_v7 = vsub.s32 0, %v4114_v59  ;;  %v3608_v10 = vld [vmem:[%s4837_s1] sm:$0xff]   ;;  %3074 = vmatprep.subr.bf16.mxu0 %v3615_v15 }
 0x111   :  { %v4083_v17 = vadd.f32 %v3025_v11, %v2997_v6  ;;  %v3028_v18 = vadd.f32 %v3027_v14, %v3026_v12  ;;  %v3610_v11 = vld [vmem:[%s4837_s1 + $0x48] sm:$0xff]   ;;  %v3614_v14 = vld [vmem:[%s4837_s1 + $0x50] sm:$0xff]  }
 0x113   :  { %v536_v20 = vadd.f32 %v535_v16, %v4083_v17  ;;  %v546_v21 = vmul.f32 %v4083_v17, %v4083_v17  ;;  %v4088_v22 = vadd.f32 %v3028_v18, %v3000_v13  ;;  %v3612_v13 = vld [vmem:[%s4837_s1 + $0x8] sm:$0xff]   ;;  %v3616_v16 = vld [vmem:[%s4837_s1 + $0x10] sm:$0xff]  }
 0x114   :  { %v3617_v18 = vld [vmem:[%s4837_s1 + $0x90] sm:$0xff]  }
 0x115   :  { %v549_v23 = vadd.f32 %v548_v19, %v546_v21  ;;  %v537_v24 = vadd.f32 %v536_v20, %v4088_v22  ;;  %v547_v25 = vmul.f32 %v4088_v22, %v4088_v22  ;;  %3075 = vmatpush3.bf16.msra.mxu0 %v3617_v18  ;;  %v3618_v19 = vld [vmem:[%s4837_s1 + $0x58] sm:$0xff]  }
 0x116   :  { %v3619_v20 = vld [vmem:[%s4837_s1 + $0xd8] sm:$0xff]  }
 0x117   :  { %v538_v26 = vrot.slane %v537_v24, 4  ;;  %v550_v27 = vadd.f32 %v549_v23, %v547_v25  ;;  %v3620_v21 = vld [vmem:[%s4837_s1 + $0x18] sm:$0xff]   ;;  %3076 = vmatprep.subr.bf16.mxu0 %v3619_v20  ;;  %v3623_v25 = vld [vmem:[%s4837_s1 + $0xe0] sm:$0xff]  }
 0x118   :  { %v3621_v23 = vld [vmem:[%s4837_s1 + $0x98] sm:$0xff]  }
 0x119   :  { %v539_v28 = vadd.f32 %v538_v26, %v537_v24  ;;  %v551_v29 = vrot.slane %v550_v27, 4  ;;  %3077 = vmatpush3.bf16.msra.mxu0 %v3621_v23  ;;  %v3622_v24 = vld [vmem:[%s4837_s1 + $0x60] sm:$0xff]  }
 0x11a   :  { %v3624_v26 = vld [vmem:[%s4837_s1 + $0x20] sm:$0xff]   ;;  %3078 = vmatprep.subr.bf16.mxu0 %v3623_v25 }
 0x11b   :  { %v540_v31 = vrot.slane %v539_v28, 2  ;;  %v552_v32 = vadd.f32 %v551_v29, %v550_v27  ;;  %v3625_v27 = vld [vmem:[%s4837_s1 + $0xa0] sm:$0xff]   ;;  %v3627_v29 = vld [vmem:[%s4837_s1 + $0xe8] sm:$0xff]  }
 0x11d   :  { %v541_v33 = vadd.f32 %v540_v31, %v539_v28  ;;  %v553_v34 = vrot.slane %v552_v32, 2  ;;  %3079 = vmatpush3.bf16.msra.mxu0 %v3625_v27  ;;  %v3626_v28 = vld [vmem:[%s4837_s1 + $0x68] sm:$0xff]   ;;  %v1181_v27 = vld [vmem:[%s4840_s5 + $0x10] sm:$0xff] }
 0x11e   :  { %v3628_v31 = vld [vmem:[%s4837_s1 + $0x28] sm:$0xff]   ;;  %3080 = vmatprep.subr.bf16.mxu0 %v3627_v29 }
 0x11f   :  { %v542_v35 = vrot.slane %v541_v33, 1  ;;  %v554_v36 = vadd.f32 %v553_v34, %v552_v32  ;;  %v3629_v32 = vld [vmem:[%s4837_s1 + $0xa8] sm:$0xff]   ;;  %v3631_v34 = vld [vmem:[%s4837_s1 + $0xf0] sm:$0xff]  }
 0x121   :  { %v555_v37 = vrot.slane %v554_v36, 1  ;;  %v543_v38 = vadd.f32 %v542_v35, %v541_v33  ;;  %v3630_v33 = vld [vmem:[%s4837_s1 + $0x70] sm:$0xff]   ;;  %3081 = vmatpush3.bf16.msra.mxu0 %v3629_v32  ;;  %v1184_v32 = vld [vmem:[%s4840_s5 + $0x28] sm:$0xff] }
 0x122   :  { %v3632_v35 = vld [vmem:[%s4837_s1 + $0x30] sm:$0xff]   ;;  %3082 = vmatprep.subr.bf16.mxu0 %v3631_v34 }
 0x123   :  { %v556_v39 = vadd.f32 %v555_v37, %v554_v36  ;;  %v3633_v36 = vld [vmem:[%s4837_s1 + $0xb0] sm:$0xff]   ;;  %v3634_v37 = vld [vmem:[%s4837_s1 + $0x78] sm:$0xff]  }
 0x124   :  { %v1185_v34 = vld [vmem:[%s4840_s5 + $0x30] sm:$0xff] }
 0x125   :  { %v557_v40 = vsel %vm97_vm1, %v543_v38, %v556_v39  ;;  %v3635_v38 = vld [vmem:[%s4837_s1 + $0xf8] sm:$0xff]   ;;  %3083 = vmatpush3.bf16.msra.mxu0 %v3633_v36 }
 0x126   :  { %3303 = vmatmul.mubr.f32.vlgmr.msra.gmra.mrb[8].mxu1 %v557_v40  ;;  %v3636_v39 = vld [vmem:[%s4837_s1 + $0x38] sm:$0xff]   ;;  %3084 = vmatprep.subr.bf16.mxu0 %v3635_v38  ;;  %v1188_v38 = vld [vmem:[%s4840_s5 + $0x48] sm:$0xff] }
 0x127   :  { %3307 = vmatprep.mubr.msk.f32.mxu1 %vm3751_vm4, %v3752_v51  ;;  %3306 = vmatpush3.msra.mxu1 %v681_v41  ;;  %v3637_v40 = vld [vmem:[%s4837_s1 + $0xb8] sm:$0xff]   ;;  %v4216_v41 = vsub.s32 1, %v4114_v59 }
 0x128   :  { %3048 = vmatprep.subr.bf16.mxu1 %v3606_v42 }
 0x129   :  { %3085 = vmatpush3.bf16.msra.mxu0 %v3637_v40  ;;  %v1189_v40 = vld [vmem:[%s4840_s5 + $0x50] sm:$0xff] }
 0x12a   :  { %3500 = vmatprep.subr.bf16.mxu0 %v3750_v30 }
 0x1f9   :  { %v640_v47 = vpop.f32.mrb[8].mxu1 }
 0x1fa   :  { %v644_v48 = vmul.f32 0.001953125, %v640_v47  ;;  %v3304_v49 = vpop.f32.mrb[9].mxu1 }
 0x1fc   :  { %v645_v50 = vmul.f32 %v644_v48, %v644_v48 }
 0x1fe   :  { %v647_v52 = vrot.slane %v645_v50, 7 }
 0x200   :  { %v649_v53 = vsub.f32 %v644_v48, %v647_v52 }
 0x202   :  { %v651_v54 = vadd.f32 1e-05, %v649_v53 }
 0x204   :  { %3718 = vrsqrt.f32 %v651_v54 }
 0x20e   :  { %v3719_v61 = vpop.eup %3718 }
 0x20f   :  { %v660_v62 = vrot.slane %v3719_v61, %v4117_v60 }
 0x211   :  { %v661_v63 = vcombine.high %v660_v62, %v660_v62 }
 0x213   :  { %v668_v3 = vrot.slane %v661_v63, %v4117_v60 }
 0x215   :  { %v670_v4 = vmul.f32 %v668_v3, %v650_v1 }
 0x217   :  { %v672_v6 = vmul.f32 %v670_v4, %v644_v48 }
 0x219   :  { %v673_v8 = vsub.f32 %v671_v5, %v672_v6 }
 0x21b   :  { %v678_v9 = vrot.slane %v673_v8, %v4128_v7 }
 0x21d   :  { %v680_v12 = vsel %vm97_vm1, %v670_v4, %v678_v9 }
 0x21e   :  { %3308 = vmatmul.mubr.msk.f32.vlgmr.msra.gmra.mrb[10].mxu1 %vm682_vm5, %v680_v12  ;;  %vm2015_vm5 = vcmask 1045504  }
 0x21f   :  { %3049 = vmatpush3.bf16.msra.mxu1 %v3608_v10  ;;  %v1179_v10 = vld [vmem:[%s4840_s5] sm:$0xff] }
 0x220   :  { %3050 = vmatprep.subr.bf16.mxu1 %v3610_v11  ;;  %v1180_v11 = vld [vmem:[%s4840_s5 + $0x8] sm:$0xff] }
 0x223   :  { %3051 = vmatpush3.bf16.msra.mxu1 %v3612_v13 }
 0x224   :  { %3052 = vmatprep.subr.bf16.mxu1 %v3614_v14 }
 0x227   :  { %3053 = vmatpush3.bf16.msra.mxu1 %v3616_v16 }
 0x228   :  { %3054 = vmatprep.subr.bf16.mxu1 %v3618_v19 }
 0x22b   :  { %3055 = vmatpush3.bf16.msra.mxu1 %v3620_v21 }
 0x22c   :  { %3056 = vmatprep.subr.bf16.mxu1 %v3622_v24  ;;  %v3477_v24 = vpack.c.bf16 %v1180_v11, %v1179_v10 }
 0x22f   :  { %3057 = vmatpush3.bf16.msra.mxu1 %v3624_v26 }
 0x230   :  { %3058 = vmatprep.subr.bf16.mxu1 %v3626_v28  ;;  %v1182_v28 = vld [vmem:[%s4840_s5 + $0x18] sm:$0xff] }
 0x231   :  { %v3480_v29 = vpack.c.bf16 %v1182_v28, %v1181_v27 }
 0x233   :  { %3059 = vmatpush3.bf16.msra.mxu1 %v3628_v31  ;;  %v1183_v31 = vld [vmem:[%s4840_s5 + $0x20] sm:$0xff] }
 0x234   :  { %3060 = vmatprep.subr.bf16.mxu1 %v3630_v33  ;;  %v3483_v33 = vpack.c.bf16 %v1184_v32, %v1183_v31 }
 0x237   :  { %3061 = vmatpush3.bf16.msra.mxu1 %v3632_v35  ;;  %v1186_v35 = vld [vmem:[%s4840_s5 + $0x38] sm:$0xff] }
 0x238   :  { %3062 = vmatprep.subr.bf16.mxu1 %v3634_v37  ;;  %v3486_v36 = vpack.c.bf16 %v1186_v35, %v1185_v34  ;;  %v1187_v37 = vld [vmem:[%s4840_s5 + $0x40] sm:$0xff] }
 0x23b   :  { %3063 = vmatpush3.bf16.msra.mxu1 %v3636_v39  ;;  %v3489_v39 = vpack.c.bf16 %v1188_v38, %v1187_v37  ;;  %v1271_v37 = vld [vmem:[%s4805_s9] sm:$0x1] }
 0x23c   :  { %3476 = vmatprep.subr.bf16.mxu1 %v3750_v30 }
 0x2f1   :  { %v752_v42 = vpop.f32.mrb[10].mxu1 }
 0x2f2   :  { %v759_v43 = vrot.slane %v752_v42, %v4128_v7  ;;  %v3309_v44 = vpop.f32.mrb[11].mxu1  ;;  %v767_v45 = vrot.slane %v752_v42, %v4216_v41  ;;  %v1190_v42 = vld [vmem:[%s4840_s5 + $0x58] sm:$0xff] }
 0x2f3   :  { %v1191_v44 = vld [vmem:[%s4840_s5 + $0x60] sm:$0xff] }
 0x2f4   :  { %v760_v46 = vmul.f32 %v759_v43, %v4073_v0  ;;  %v761_v47 = vmul.f32 %v759_v43, %v4075_v2  ;;  %v762_v48 = vmul.f32 %v759_v43, %v4083_v17  ;;  %v763_v49 = vmul.f32 %v759_v43, %v4088_v22 }
 0x2f5   :  { %v3492_v43 = vpack.c.bf16 %v1190_v42, %v1189_v40  ;;  %v1292_v40 = vld [vmem:[%s4806_s10] sm:$0x1] }
 0x2f6   :  { %v768_v50 = vadd.f32 %v767_v45, %v760_v46  ;;  %v769_v52 = vadd.f32 %v767_v45, %v761_v47  ;;  %v770_v53 = vadd.f32 %v767_v45, %v762_v48  ;;  %v771_v54 = vadd.f32 %v767_v45, %v763_v49  ;;  %v1192_v45 = vld [vmem:[%s4840_s5 + $0x68] sm:$0xff]  ;;  %v1193_v47 = vld [vmem:[%s4840_s5 + $0x70] sm:$0xff]  ;;  %v1194_v48 = vld [vmem:[%s4840_s5 + $0x78] sm:$0xff] }
 0x2f7   :  { %v3495_v46 = vpack.c.bf16 %v1192_v45, %v1191_v44  ;;  %v3498_v49 = vpack.c.bf16 %v1194_v48, %v1193_v47  ;;  %v3640_v45 = vld [vmem:[%s4807_s11] sm:$0xff]   ;;  %v3642_v47 = vld [vmem:[%s4807_s11 + $0x48] sm:$0xff]  }
 0x2f8   :  { %vm772_vm6 = vcmp.ge.f32.partialorder %v768_v50, 0.0  ;;  %vm773_vm7 = vcmp.ge.f32.partialorder %v769_v52, 0.0  ;;  %vm774_vm8 = vcmp.ge.f32.partialorder %v770_v53, 0.0  ;;  %vm775_vm9 = vcmp.ge.f32.partialorder %v771_v54, 0.0  ;;  %v3643_v48 = vld [vmem:[%s4807_s11 + $0xc8] sm:$0xff]  }
 0x2f9   :  { %v776_v55 = vmul.f32 0.2, %v768_v50  ;;  %v777_v56 = vmul.f32 0.2, %v769_v52  ;;  %v778_v57 = vmul.f32 0.2, %v770_v53 }
 0x2fa   :  { %v779_v58 = vmul.f32 0.2, %v771_v54 }
 0x2fb   :  { %v780_v59 = vsel %vm772_vm6, %v768_v50, %v776_v55  ;;  %v781_v0 = vsel %vm773_vm7, %v769_v52, %v777_v56  ;;  %v782_v61 = vsel %vm774_vm8, %v770_v53, %v778_v57  ;;  %vm2017_vm6 = vcmask 1046528  }
 0x2fc   :  { %v783_v2 = vsel %vm775_vm9, %v771_v54, %v779_v58  ;;  %v786_v62 = vrot.slane %v780_v59, 7  ;;  %v787_v17 = vrot.slane %v781_v0, 7  ;;  %v794_v63 = vrot.slane %v782_v61, 5 }
 0x2fd   :  { %v795_v22 = vrot.slane %v783_v2, 5 }
 0x2fe   :  { %v788_v1 = vsel %vm97_vm1, %v786_v62, %v787_v17  ;;  %v800_v3 = vsel %vm97_vm1, 0.0, %v786_v62  ;;  %v801_v4 = vsel %vm97_vm1, %v787_v17, 0.0 }
 0x2ff   :  { %v796_v5 = vsel %vm114_vm2, %v794_v63, %v795_v22  ;;  %v802_v6 = vsel %vm129_vm3, %v801_v4, 0.0  ;;  %v804_v8 = vsel %vm114_vm2, %v795_v22, 0.0  ;;  %805 = vst [vmem:[#allocation2] sm:$0xff] %v800_v3  ;;  %806 = vst [vmem:[#allocation2 + $0x8] sm:$0xff] %v788_v1 }
 0x300   :  { %v803_v9 = vsel %vm114_vm2, %v802_v6, %v794_v63  ;;  %808 = vst [vmem:[#allocation2 + $0x18] sm:$0xff] %v796_v5  ;;  %809 = vst [vmem:[#allocation2 + $0x20] sm:$0xf] %v804_v8 }
 0x301   :  { %807 = vst [vmem:[#allocation2 + $0x10] sm:$0xff] %v803_v9 }
 0x306   :  { %v812_v12 = vld [vmem:[#allocation2 + $0x1] ss:$2 sm:$0xff]  ;;  %v810_v13 = vld [vmem:[#allocation2] ss:$2 sm:$0xff] }
 0x308   :  { %v813_v14 = vld [vmem:[#allocation2 + $0x13] ss:$2 sm:$0xff]  ;;  %v817_v15 = vld [vmem:[#allocation2 + $0x3] ss:$2 sm:$0xff]  ;;  %v811_v20 = vld [vmem:[#allocation2 + $0x12] ss:$2 sm:$0xff] }
 0x309   :  { %v819_v16 = vld [vmem:[#allocation2 + $0x15] ss:$2 sm:$0xff]  ;;  %v821_v18 = vpack.c.bf16 %v813_v14, %v812_v12  ;;  %v814_v21 = vld [vmem:[#allocation2 + $0x2] ss:$2 sm:$0xff]  ;;  %v820_v25 = vpack.c.bf16 %v811_v20, %v810_v13 }
 0x30a   :  { %v823_v19 = vpack.c.bf16 %v819_v16, %v817_v15  ;;  %v816_v23 = vld [vmem:[#allocation2 + $0x14] ss:$2 sm:$0xff]  ;;  %v1303_v20 = vld [vmem:[%s4804_s8 + $0x8] sm:$0xff] }
 0x30b   :  { %v822_v26 = vpack.c.bf16 %v816_v23, %v814_v21  ;;  %1112 = vmatprep.mubr.bf16.mxu1 %v821_v18  ;;  %v3638_v23 = vld [vmem:[%s4807_s11 + $0x40] sm:$0xff]  }
 0x30c   :  { %1153 = vmatprep.mubr.bf16.mxu0 %v823_v19  ;;  %1113 = vmatmul.mubr.bf16.vlgmr.msra.gmra.mrb[12].mxu1 %v820_v25  ;;  %v1302_v19 = vld [vmem:[%s4804_s8] sm:$0xff] }
 0x30d   :  { %1154 = vmatmul.mubr.bf16.vlgmr.msra.gmra.mrb[8].mxu0 %v822_v26  ;;  %3478 = vmatpush3.bf16.msra.mxu1 %v3477_v24  ;;  %v3501_v21 = vpack.c.bf16 %v1303_v20, %v1302_v19  ;;  %v3639_v24 = vld [vmem:[%s4807_s11 + $0xc0] sm:$0xff]  }
 0x30e   :  { %3342 = vmatprep.mubr.msk.f32.mxu1 %vm3751_vm4, %v3752_v51  ;;  %3479 = vmatprep.subr.bf16.mxu1 %v3750_v30  ;;  %v3641_v25 = vld [vmem:[%s4807_s11 + $0x80] sm:$0xff]  }
 0x30f   :  { %3349 = vmatprep.mubr.msk.f32.mxu0 %vm3751_vm4, %v3752_v51  ;;  %3502 = vmatpush3.bf16.msra.mxu0 %v3501_v21 }
 0x310   :  { %3112 = vmatprep.subr.bf16.mxu0 %v3638_v23 }
 0x311   :  { %3481 = vmatpush3.bf16.msra.mxu1 %v3480_v29 }
 0x312   :  { %3482 = vmatprep.subr.bf16.mxu1 %v3750_v30 }
 0x315   :  { %3484 = vmatpush3.bf16.msra.mxu1 %v3483_v33 }
 0x316   :  { %3485 = vmatprep.subr.bf16.mxu1 %v3750_v30 }
 0x319   :  { %3487 = vmatpush3.bf16.msra.mxu1 %v3486_v36 }
 0x31a   :  { %3488 = vmatprep.subr.bf16.mxu1 %v3750_v30 }
 0x31d   :  { %3490 = vmatpush3.bf16.msra.mxu1 %v3489_v39 }
 0x31e   :  { %3491 = vmatprep.subr.bf16.mxu1 %v3750_v30 }
 0x321   :  { %3493 = vmatpush3.bf16.msra.mxu1 %v3492_v43 }
 0x322   :  { %3494 = vmatprep.subr.bf16.mxu1 %v3750_v30 }
 0x325   :  { %3496 = vmatpush3.bf16.msra.mxu1 %v3495_v46 }
 0x326   :  { %3497 = vmatprep.subr.bf16.mxu1 %v3750_v30 }
 0x329   :  { %3499 = vmatpush3.bf16.msra.mxu1 %v3498_v49  ;;  %v3644_v49 = vld [vmem:[%s4807_s11 + $0x8] sm:$0xff]  }
 0x32a   :  { %3134 = vmatprep.subr.bf16.mxu1 %v3639_v24 }
 0x3df   :  { %v3064_v50 = vpop.f32.mrb[12].mxu1 }
 0x3e0   :  { %v3086_v52 = vpop.f32.mrb[8].mxu0  ;;  %v3065_v53 = vpop.f32.mrb[13].mxu1 }
 0x3e1   :  { %v3087_v54 = vpop.f32.mrb[9].mxu0  ;;  %v3066_v55 = vadd.f32 %v3065_v53, %v3064_v50  ;;  %v3067_v57 = vpop.f32.mrb[14].mxu1  ;;  %v3645_v50 = vld [vmem:[%s4807_s11 + $0x88] sm:$0xff]   ;;  %v3647_v53 = vld [vmem:[%s4807_s11 + $0xd0] sm:$0xff]  }
 0x3e2   :  { %v3088_v56 = vadd.f32 %v3087_v54, %v3086_v52  ;;  %v3089_v58 = vpop.f32.mrb[10].mxu0  ;;  %v3068_v59 = vpop.f32.mrb[15].mxu1  ;;  %v3646_v52 = vld [vmem:[%s4807_s11 + $0x50] sm:$0xff]  }
 0x3e3   :  { %v3090_v0 = vpop.f32.mrb[11].mxu0  ;;  %v3069_v2 = vadd.f32 %v3068_v59, %v3067_v57  ;;  %v3648_v54 = vld [vmem:[%s4807_s11 + $0x10] sm:$0xff]   ;;  %v3651_v57 = vld [vmem:[%s4807_s11 + $0xd8] sm:$0xff]  }
 0x3e4   :  { %v4290_v61 = vadd.f32 %v3088_v56, %v3066_v55  ;;  %v3091_v62 = vadd.f32 %v3090_v0, %v3089_v58  ;;  %v3649_v55 = vld [vmem:[%s4807_s11 + $0x90] sm:$0xff]   ;;  %v3650_v56 = vld [vmem:[%s4807_s11 + $0x58] sm:$0xff]   ;;  %v3654_v0 = vld [vmem:[%s4807_s11 + $0x60] sm:$0xff]  }
 0x3e5   :  { %v3652_v58 = vld [vmem:[%s4807_s11 + $0x18] sm:$0xff]  }
 0x3e6   :  { %v4292_v17 = vadd.f32 %v3091_v62, %v3069_v2  ;;  %v1169_v63 = vmul.f32 %v4290_v61, %v4290_v61  ;;  %v3653_v59 = vld [vmem:[%s4807_s11 + $0x98] sm:$0xff]   ;;  %v3655_v2 = vld [vmem:[%s4807_s11 + $0xe0] sm:$0xff]  }
 0x3e7   :  { %v3656_v62 = vld [vmem:[%s4807_s11 + $0x20] sm:$0xff]  }
 0x3e8   :  { %v1162_v22 = vadd.f32 %v4292_v17, %v4290_v61  ;;  %v1170_v1 = vmul.f32 %v4292_v17, %v4292_v17 }
 0x3ea   :  { %v1163_v3 = vrot.slane %v1162_v22, 4  ;;  %v1171_v4 = vadd.f32 %v1170_v1, %v1169_v63  ;;  %v3657_v63 = vld [vmem:[%s4807_s11 + $0xa0] sm:$0xff]   ;;  %v3659_v1 = vld [vmem:[%s4807_s11 + $0xe8] sm:$0xff]  }
 0x3ec   :  { %v1164_v5 = vadd.f32 %v1163_v3, %v1162_v22  ;;  %v1172_v6 = vrot.slane %v1171_v4, 4  ;;  %v3658_v22 = vld [vmem:[%s4807_s11 + $0x68] sm:$0xff]  }
 0x3ed   :  { %v3660_v3 = vld [vmem:[%s4807_s11 + $0x28] sm:$0xff]  }
 0x3ee   :  { %v1165_v8 = vrot.slane %v1164_v5, 2  ;;  %v1173_v9 = vadd.f32 %v1172_v6, %v1171_v4  ;;  %v3661_v4 = vld [vmem:[%s4807_s11 + $0xa8] sm:$0xff]   ;;  %v3663_v6 = vld [vmem:[%s4807_s11 + $0xf0] sm:$0xff]  }
 0x3f0   :  { %v1166_v10 = vadd.f32 %v1165_v8, %v1164_v5  ;;  %v1174_v11 = vrot.slane %v1173_v9, 2  ;;  %v3662_v5 = vld [vmem:[%s4807_s11 + $0x70] sm:$0xff]  }
 0x3f1   :  { %v3664_v8 = vld [vmem:[%s4807_s11 + $0x30] sm:$0xff]  }
 0x3f2   :  { %v1167_v12 = vrot.slane %v1166_v10, 1  ;;  %v1175_v13 = vadd.f32 %v1174_v11, %v1173_v9  ;;  %v3665_v9 = vld [vmem:[%s4807_s11 + $0xb0] sm:$0xff]   ;;  %v3667_v11 = vld [vmem:[%s4807_s11 + $0xf8] sm:$0xff]  }
 0x3f4   :  { %v1176_v14 = vrot.slane %v1175_v13, 1  ;;  %v1168_v15 = vadd.f32 %v1167_v12, %v1166_v10  ;;  %v3666_v10 = vld [vmem:[%s4807_s11 + $0x78] sm:$0xff]  }
 0x3f5   :  { %v3668_v12 = vld [vmem:[%s4807_s11 + $0x38] sm:$0xff]  }
 0x3f6   :  { %v1177_v16 = vadd.f32 %v1176_v14, %v1175_v13  ;;  %v3669_v13 = vld [vmem:[%s4807_s11 + $0xb8] sm:$0xff]  }
 0x3f8   :  { %v1178_v18 = vsel %vm97_vm1, %v1168_v15, %v1177_v16 }
 0x3f9   :  { %3343 = vmatmul.mubr.f32.vlgmr.msra.gmra.mrb[16].mxu1 %v1178_v18 }
 0x3fa   :  { %3135 = vmatpush3.bf16.msra.mxu1 %v3641_v25 }
 0x3fb   :  { %3136 = vmatprep.subr.bf16.mxu1 %v3643_v48 }
 0x3fe   :  { %3137 = vmatpush3.bf16.msra.mxu1 %v3645_v50 }
 0x3ff   :  { %3138 = vmatprep.subr.bf16.mxu1 %v3647_v53 }
 0x402   :  { %3139 = vmatpush3.bf16.msra.mxu1 %v3649_v55 }
 0x403   :  { %3140 = vmatprep.subr.bf16.mxu1 %v3651_v57  ;;  %v1795_v57 = vld [vmem:[%s4808_s12 + $0x10] sm:$0xff] }
 0x406   :  { %3141 = vmatpush3.bf16.msra.mxu1 %v3653_v59 }
 0x407   :  { %3142 = vmatprep.subr.bf16.mxu1 %v3655_v2 }
 0x40a   :  { %3143 = vmatpush3.bf16.msra.mxu1 %v3657_v63  ;;  %v1798_v63 = vld [vmem:[%s4808_s12 + $0x28] sm:$0xff] }
 0x40b   :  { %3144 = vmatprep.subr.bf16.mxu1 %v3659_v1  ;;  %v1799_v1 = vld [vmem:[%s4808_s12 + $0x30] sm:$0xff] }
 0x40e   :  { %3145 = vmatpush3.bf16.msra.mxu1 %v3661_v4 }
 0x40f   :  { %3146 = vmatprep.subr.bf16.mxu1 %v3663_v6  ;;  %v1802_v6 = vld [vmem:[%s4808_s12 + $0x48] sm:$0xff] }
 0x412   :  { %3147 = vmatpush3.bf16.msra.mxu1 %v3665_v9  ;;  %v1803_v9 = vld [vmem:[%s4808_s12 + $0x50] sm:$0xff] }
 0x413   :  { %3148 = vmatprep.subr.bf16.mxu1 %v3667_v11  ;;  %v1805_v11 = vld [vmem:[%s4808_s12 + $0x60] sm:$0xff] }
 0x416   :  { %3149 = vmatpush3.bf16.msra.mxu1 %v3669_v13  ;;  %v1806_v13 = vld [vmem:[%s4808_s12 + $0x68] sm:$0xff] }
 0x4cc   :  { %v1261_v26 = vpop.f32.mrb[16].mxu1 }
 0x4cd   :  { %v1265_v27 = vmul.f32 0.0078125, %v1261_v26  ;;  %v3344_v28 = vpop.f32.mrb[17].mxu1 }
 0x4cf   :  { %v1266_v29 = vmul.f32 %v1265_v27, %v1265_v27 }
 0x4d1   :  { %v1268_v31 = vrot.slane %v1266_v29, 7 }
 0x4d3   :  { %v1270_v32 = vsub.f32 %v1265_v27, %v1268_v31 }
 0x4d5   :  { %v1272_v33 = vadd.f32 1e-05, %v1270_v32 }
 0x4d7   :  { %3720 = vrsqrt.f32 %v1272_v33 }
 0x4e1   :  { %v3721_v34 = vpop.eup %3720 }
 0x4e2   :  { %v1281_v35 = vrot.slane %v3721_v34, %v4117_v60 }
 0x4e4   :  { %v1282_v36 = vcombine.high %v1281_v35, %v1281_v35 }
 0x4e6   :  { %v1289_v38 = vrot.slane %v1282_v36, %v4117_v60 }
 0x4e8   :  { %v1291_v39 = vmul.f32 %v1289_v38, %v1271_v37 }
 0x4ea   :  { %v1293_v42 = vmul.f32 %v1291_v39, %v1265_v27 }
 0x4ec   :  { %v1294_v43 = vsub.f32 %v1292_v40, %v1293_v42  ;;  %v1793_v40 = vld [vmem:[%s4808_s12] sm:$0xff]  ;;  %v1794_v42 = vld [vmem:[%s4808_s12 + $0x8] sm:$0xff] }
 0x4ee   :  { %v1299_v44 = vrot.slane %v1294_v43, %v4128_v7 }
 0x4f0   :  { %v1301_v46 = vsel %vm97_vm1, %v1291_v39, %v1299_v44 }
 0x4f1   :  { %3350 = vmatmul.mubr.msk.f32.vlgmr.msra.gmra.mrb[12].mxu0 %vm1304_vm10, %v1301_v46 }
 0x4f2   :  { %3113 = vmatpush3.bf16.msra.mxu0 %v3640_v45 }
 0x4f3   :  { %3114 = vmatprep.subr.bf16.mxu0 %v3642_v47 }
 0x4f6   :  { %3115 = vmatpush3.bf16.msra.mxu0 %v3644_v49 }
 0x4f7   :  { %3116 = vmatprep.subr.bf16.mxu0 %v3646_v52 }
 0x4fa   :  { %3117 = vmatpush3.bf16.msra.mxu0 %v3648_v54  ;;  %v3504_v54 = vpack.c.bf16 %v1794_v42, %v1793_v40 }
 0x4fb   :  { %3118 = vmatprep.subr.bf16.mxu0 %v3650_v56 }
 0x4fe   :  { %3119 = vmatpush3.bf16.msra.mxu0 %v3652_v58  ;;  %v1796_v58 = vld [vmem:[%s4808_s12 + $0x18] sm:$0xff] }
 0x4ff   :  { %3120 = vmatprep.subr.bf16.mxu0 %v3654_v0  ;;  %v3507_v2 = vpack.c.bf16 %v1796_v58, %v1795_v57 }
 0x502   :  { %3121 = vmatpush3.bf16.msra.mxu0 %v3656_v62  ;;  %v1797_v62 = vld [vmem:[%s4808_s12 + $0x20] sm:$0xff] }
 0x503   :  { %3122 = vmatprep.subr.bf16.mxu0 %v3658_v22  ;;  %v3510_v22 = vpack.c.bf16 %v1798_v63, %v1797_v62 }
 0x506   :  { %3123 = vmatpush3.bf16.msra.mxu0 %v3660_v3  ;;  %v1800_v3 = vld [vmem:[%s4808_s12 + $0x38] sm:$0xff] }
 0x507   :  { %3124 = vmatprep.subr.bf16.mxu0 %v3662_v5  ;;  %v3513_v4 = vpack.c.bf16 %v1800_v3, %v1799_v1  ;;  %v1801_v5 = vld [vmem:[%s4808_s12 + $0x40] sm:$0xff] }
 0x508   :  { %v1885_v1 = vld [vmem:[%s4810_s14] sm:$0x1] }
 0x50a   :  { %3125 = vmatpush3.bf16.msra.mxu0 %v3664_v8  ;;  %v3516_v8 = vpack.c.bf16 %v1802_v6, %v1801_v5  ;;  %v1906_v5 = vld [vmem:[%s4811_s15] sm:$0x1] }
 0x50b   :  { %3126 = vmatprep.subr.bf16.mxu0 %v3666_v10  ;;  %v1804_v10 = vld [vmem:[%s4808_s12 + $0x58] sm:$0xff] }
 0x50e   :  { %3127 = vmatpush3.bf16.msra.mxu0 %v3668_v12  ;;  %v3519_v12 = vpack.c.bf16 %v1804_v10, %v1803_v9  ;;  %v3671_v10 = vld [vmem:[%s4812_s16 + $0x80] sm:$0xff]  }
 0x50f   :  { %3503 = vmatprep.subr.bf16.mxu0 %v3750_v30 }
 0x5c4   :  { %v1374_v14 = vpop.f32.mrb[12].mxu0 }
 0x5c5   :  { %v1381_v15 = vrot.slane %v1374_v14, %v4128_v7  ;;  %v3351_v16 = vpop.f32.mrb[13].mxu0  ;;  %v1387_v20 = vrot.slane %v1374_v14, %v4216_v41  ;;  %v3522_v14 = vpack.c.bf16 %v1806_v13, %v1805_v11  ;;  %v3675_v13 = vld [vmem:[%s4812_s16 + $0x88] sm:$0xff]  }
 0x5c6   :  { %v1808_v16 = vld [vmem:[%s4808_s12 + $0x78] sm:$0xff] }
 0x5c7   :  { %v1382_v18 = vmul.f32 %v1381_v15, %v4290_v61  ;;  %v1383_v19 = vmul.f32 %v1381_v15, %v4292_v17  ;;  %v1807_v15 = vld [vmem:[%s4808_s12 + $0x70] sm:$0xff] }
 0x5c9   :  { %v1388_v21 = vadd.f32 %v1387_v20, %v1382_v18  ;;  %v1389_v23 = vadd.f32 %v1387_v20, %v1383_v19  ;;  %v3525_v18 = vpack.c.bf16 %v1808_v16, %v1807_v15  ;;  %v3677_v15 = vld [vmem:[%s4812_s16 + $0x8] sm:$0xff]   ;;  %v3678_v16 = vld [vmem:[%s4812_s16 + $0xd0] sm:$0xff]  }
 0x5cb   :  { %vm1390_vm11 = vcmp.ge.f32.partialorder %v1388_v21, 0.0  ;;  %vm1391_vm12 = vcmp.ge.f32.partialorder %v1389_v23, 0.0  ;;  %v1392_v24 = vmul.f32 0.2, %v1388_v21  ;;  %v1393_v25 = vmul.f32 0.2, %v1389_v23 }
 0x5cd   :  { %v1394_v26 = vsel %vm1390_vm11, %v1388_v21, %v1392_v24  ;;  %v1395_v27 = vsel %vm1391_vm12, %v1389_v23, %v1393_v25 }
 0x5ce   :  { %v1397_v28 = vrot.slane %v1394_v26, 7  ;;  %v1400_v29 = vrot.slane %v1395_v27, 5 }
 0x5d0   :  { %v1402_v31 = vsel %vm97_vm1, 0.0, %v1397_v28  ;;  %v1403_v32 = vsel %vm97_vm1, %v1397_v28, 0.0  ;;  %v1406_v61 = vsel %vm114_vm2, %v1400_v29, 0.0 }
 0x5d1   :  { %v1404_v17 = vsel %vm129_vm3, %v1403_v32, 0.0  ;;  %1407 = vst [vmem:[#allocation2] sm:$0xff] %v1402_v31  ;;  %1409 = vst [vmem:[#allocation2 + $0x10] sm:$0xf] %v1406_v61 }
 0x5d2   :  { %v1405_v33 = vsel %vm114_vm2, %v1404_v17, %v1400_v29 }
 0x5d3   :  { %1408 = vst [vmem:[#allocation2 + $0x8] sm:$0xff] %v1405_v33 }
 0x5d8   :  { %v1418_v34 = vld [vmem:[#allocation2 + $0x1] ss:$2 sm:$0xf]  ;;  %v1410_v48 = vld [vmem:[#allocation2] ss:$2 sm:$0xf] }
 0x5da   :  { %v1420_v35 = vld [vmem:[#allocation2 + $0xb] ss:$2 sm:$0xf]  ;;  %v1412_v39 = vld [vmem:[#allocation2 + $0xa] ss:$2 sm:$0xf] }
 0x5db   :  { %v1422_v36 = vrot.slane %v1420_v35, 4  ;;  %v1434_v37 = vld [vmem:[#allocation2 + $0xd] ss:$2 sm:$0xf]  ;;  %v1414_v45 = vrot.slane %v1412_v39, 4 }
 0x5dc   :  { %v1436_v38 = vrot.slane %v1434_v37, 4  ;;  %v1432_v44 = vld [vmem:[#allocation2 + $0x3] ss:$2 sm:$0xf] }
 0x5dd   :  { %v1424_v43 = vsel %vm1416_vm13, %v1418_v34, %v1422_v36  ;;  %v1427_v49 = vld [vmem:[#allocation2 + $0xc] ss:$2 sm:$0xf]  ;;  %v1417_v52 = vsel %vm1416_vm13, %v1410_v48, %v1414_v45  ;;  %v1425_v56 = vld [vmem:[#allocation2 + $0x2] ss:$2 sm:$0xf] }
 0x5de   :  { %v1440_v46 = vpack.c.bf16 %v1424_v43, %v1424_v43  ;;  %v1438_v47 = vsel %vm1416_vm13, %v1432_v44, %v1436_v38  ;;  %v1429_v53 = vrot.slane %v1427_v49, 4  ;;  %v1439_v55 = vpack.c.bf16 %v1417_v52, %v1417_v52  ;;  %v1916_v45 = vld [vmem:[%s4809_s13] sm:$0xff]  ;;  %v1918_v48 = vld [vmem:[%s4809_s13 + $0x10] sm:$0xff]  ;;  %v1919_v49 = vld [vmem:[%s4809_s13 + $0x18] sm:$0xff] }
 0x5df   :  { %v1442_v50 = vpack.c.bf16 %v1438_v47, %v1438_v47  ;;  %v3670_v52 = vld [vmem:[%s4812_s16 + $0xc0] sm:$0xff]  }
 0x5e0   :  { %1731 = vmatprep.mubr.bf16.mxu0 %v1440_v46  ;;  %v1431_v59 = vsel %vm1416_vm13, %v1425_v56, %v1429_v53  ;;  %v1917_v46 = vld [vmem:[%s4809_s13 + $0x8] sm:$0xff]  ;;  %v3672_v53 = vld [vmem:[%s4812_s16 + $0x40] sm:$0xff]  }
 0x5e1   :  { %1771 = vmatprep.mubr.bf16.mxu1 %v1442_v50  ;;  %1732 = vmatmul.mubr.bf16.vlgmr.msra.gmra.mrb[16].mxu0 %v1439_v55  ;;  %v1441_v0 = vpack.c.bf16 %v1431_v59, %v1431_v59  ;;  %v3528_v47 = vpack.c.bf16 %v1917_v46, %v1916_v45  ;;  %v3531_v50 = vpack.c.bf16 %v1919_v49, %v1918_v48 }
 0x5e2   :  { %3505 = vmatpush3.bf16.msra.mxu0 %v3504_v54  ;;  %3384 = vmatprep.mubr.msk.f32.mxu0 %vm3751_vm4, %v3752_v51  ;;  %v3673_v54 = vld [vmem:[%s4812_s16] sm:$0xff]  }
 0x5e3   :  { %1772 = vmatmul.mubr.bf16.vlgmr.msra.gmra.mrb[20].mxu1 %v1441_v0  ;;  %3506 = vmatprep.subr.bf16.mxu0 %v3750_v30 }
 0x5e4   :  { %3178 = vmatprep.subr.bf16.mxu1 %v3672_v53 }
 0x5e5   :  { %3179 = vmatpush3.bf16.msra.mxu1 %v3673_v54 }
 0x5e6   :  { %3508 = vmatpush3.bf16.msra.mxu0 %v3507_v2 }
 0x5e7   :  { %3509 = vmatprep.subr.bf16.mxu0 %v3750_v30 }
 0x5ea   :  { %3511 = vmatpush3.bf16.msra.mxu0 %v3510_v22 }
 0x5eb   :  { %3512 = vmatprep.subr.bf16.mxu0 %v3750_v30 }
 0x5ee   :  { %3514 = vmatpush3.bf16.msra.mxu0 %v3513_v4 }
 0x5ef   :  { %3515 = vmatprep.subr.bf16.mxu0 %v3750_v30 }
 0x5f2   :  { %3517 = vmatpush3.bf16.msra.mxu0 %v3516_v8 }
 0x5f3   :  { %3518 = vmatprep.subr.bf16.mxu0 %v3750_v30 }
 0x5f6   :  { %3520 = vmatpush3.bf16.msra.mxu0 %v3519_v12  ;;  %v3674_v12 = vld [vmem:[%s4812_s16 + $0xc8] sm:$0xff]  }
 0x5f7   :  { %3521 = vmatprep.subr.bf16.mxu0 %v3750_v30 }
 0x5fa   :  { %3523 = vmatpush3.bf16.msra.mxu0 %v3522_v14  ;;  %v3676_v14 = vld [vmem:[%s4812_s16 + $0x48] sm:$0xff]  }
 0x5fb   :  { %3524 = vmatprep.subr.bf16.mxu0 %v3750_v30  ;;  %3180 = vmatprep.subr.bf16.mxu1 %v3676_v14 }
 0x5fc   :  { %3181 = vmatpush3.bf16.msra.mxu1 %v3677_v15 }
 0x5fe   :  { %3526 = vmatpush3.bf16.msra.mxu0 %v3525_v18  ;;  %v3679_v18 = vld [vmem:[%s4812_s16 + $0x90] sm:$0xff]  }
 0x5ff   :  { %3527 = vmatprep.subr.bf16.mxu0 %v3750_v30 }
 0x6b4   :  { %v3128_v19 = vpop.f32.mrb[16].mxu0 }
 0x6b5   :  { %v3129_v20 = vpop.f32.mrb[17].mxu0 }
 0x6b6   :  { %v3150_v21 = vpop.f32.mrb[20].mxu1  ;;  %v3130_v23 = vadd.f32 %v3129_v20, %v3128_v19  ;;  %v3131_v24 = vpop.f32.mrb[18].mxu0  ;;  %v3680_v19 = vld [vmem:[%s4812_s16 + $0x50] sm:$0xff]  }
 0x6b7   :  { %v3151_v25 = vpop.f32.mrb[21].mxu1  ;;  %v3132_v26 = vpop.f32.mrb[19].mxu0  ;;  %v3681_v20 = vld [vmem:[%s4812_s16 + $0x10] sm:$0xff]   ;;  %3182 = vmatprep.subr.bf16.mxu1 %v3680_v19  ;;  %v3684_v24 = vld [vmem:[%s4812_s16 + $0x58] sm:$0xff]  }
 0x6b8   :  { %v3152_v27 = vadd.f32 %v3151_v25, %v3150_v21  ;;  %v3153_v28 = vpop.f32.mrb[22].mxu1  ;;  %v3682_v21 = vld [vmem:[%s4812_s16 + $0xd8] sm:$0xff]   ;;  %3183 = vmatpush3.bf16.msra.mxu1 %v3681_v20  ;;  %v3686_v26 = vld [vmem:[%s4812_s16 + $0xe0] sm:$0xff]   ;;  %v2408_v20 = vld [vmem:[%s4813_s17 + $0x10] sm:$0xff] }
 0x6b9   :  { %v3154_v29 = vpop.f32.mrb[23].mxu1  ;;  %v3685_v25 = vld [vmem:[%s4812_s16 + $0x18] sm:$0xff]   ;;  %3184 = vmatprep.subr.bf16.mxu1 %v3684_v24  ;;  %v3688_v28 = vld [vmem:[%s4812_s16 + $0x60] sm:$0xff]  }
 0x6ba   :  { %v4485_v31 = vadd.f32 %v3152_v27, %v3130_v23  ;;  %v3683_v23 = vld [vmem:[%s4812_s16 + $0x98] sm:$0xff]   ;;  %v3687_v27 = vld [vmem:[%s4812_s16 + $0xa0] sm:$0xff]  }
 0x6bb   :  { %v3689_v29 = vld [vmem:[%s4812_s16 + $0x20] sm:$0xff]  }
 0x6bc   :  { %v1779_v32 = vrot.slane %v4485_v31, 4  ;;  %v1785_v61 = vmul.f32 %v4485_v31, %v4485_v31  ;;  %3185 = vmatpush3.bf16.msra.mxu1 %v3685_v25  ;;  %v2410_v24 = vld [vmem:[%s4813_s17 + $0x20] sm:$0xff]  ;;  %v2411_v25 = vld [vmem:[%s4813_s17 + $0x28] sm:$0xff] }
 0x6bd   :  { %3186 = vmatprep.subr.bf16.mxu1 %v3688_v28 }
 0x6be   :  { %v1780_v17 = vadd.f32 %v1779_v32, %v4485_v31  ;;  %v1786_v33 = vrot.slane %v1785_v61, 4  ;;  %v3690_v32 = vld [vmem:[%s4812_s16 + $0xe8] sm:$0xff]  }
 0x6c0   :  { %v1781_v34 = vrot.slane %v1780_v17, 2  ;;  %v1787_v35 = vadd.f32 %v1786_v33, %v1785_v61  ;;  %3187 = vmatpush3.bf16.msra.mxu1 %v3689_v29  ;;  %v3691_v61 = vld [vmem:[%s4812_s16 + $0xa8] sm:$0xff]   ;;  %v2414_v29 = vld [vmem:[%s4813_s17 + $0x40] sm:$0xff] }
 0x6c1   :  { %v3693_v33 = vld [vmem:[%s4812_s16 + $0x28] sm:$0xff]  }
 0x6c2   :  { %v1782_v36 = vadd.f32 %v1781_v34, %v1780_v17  ;;  %v1788_v37 = vrot.slane %v1787_v35, 2  ;;  %v3692_v17 = vld [vmem:[%s4812_s16 + $0x68] sm:$0xff]   ;;  %v3694_v34 = vld [vmem:[%s4812_s16 + $0xf0] sm:$0xff]  }
 0x6c3   :  { %3188 = vmatprep.subr.bf16.mxu1 %v3692_v17  ;;  %v2416_v17 = vld [vmem:[%s4813_s17 + $0x50] sm:$0xff] }
 0x6c4   :  { %v1783_v38 = vrot.slane %v1782_v36, 1  ;;  %v1789_v39 = vadd.f32 %v1788_v37, %v1787_v35  ;;  %v3696_v35 = vld [vmem:[%s4812_s16 + $0x70] sm:$0xff]   ;;  %v3698_v37 = vld [vmem:[%s4812_s16 + $0xf8] sm:$0xff]   ;;  %3189 = vmatpush3.bf16.msra.mxu1 %v3693_v33 }
 0x6c5   :  { %3190 = vmatprep.subr.bf16.mxu1 %v3696_v35  ;;  %v2417_v33 = vld [vmem:[%s4813_s17 + $0x58] sm:$0xff]  ;;  %v2418_v35 = vld [vmem:[%s4813_s17 + $0x60] sm:$0xff] }
 0x6c6   :  { %v1790_v40 = vrot.slane %v1789_v39, 1  ;;  %v1784_v42 = vadd.f32 %v1783_v38, %v1782_v36  ;;  %v3695_v36 = vld [vmem:[%s4812_s16 + $0xb0] sm:$0xff]  }
 0x6c7   :  { %v3697_v38 = vld [vmem:[%s4812_s16 + $0x30] sm:$0xff]  }
 0x6c8   :  { %v1791_v43 = vadd.f32 %v1790_v40, %v1789_v39  ;;  %v3700_v39 = vld [vmem:[%s4812_s16 + $0x78] sm:$0xff]   ;;  %3191 = vmatpush3.bf16.msra.mxu1 %v3697_v38  ;;  %v2420_v38 = vld [vmem:[%s4813_s17 + $0x70] sm:$0xff] }
 0x6c9   :  { %v3699_v40 = vld [vmem:[%s4812_s16 + $0xb8] sm:$0xff]   ;;  %3192 = vmatprep.subr.bf16.mxu1 %v3700_v39 }
 0x6ca   :  { %v1792_v44 = vsel %vm97_vm1, %v1784_v42, %v1791_v43  ;;  %v3701_v42 = vld [vmem:[%s4812_s16 + $0x38] sm:$0xff]  }
 0x6cb   :  { %3385 = vmatmul.mubr.f32.vlgmr.msra.gmra.mrb[14].mxu0 %v1792_v44  ;;  %v2421_v39 = vld [vmem:[%s4813_s17 + $0x78] sm:$0xff] }
 0x6cc   :  { %3395 = vmatprep.mubr.msk.f32.mxu0 %vm3751_vm4, %v3752_v51  ;;  %3529 = vmatpush3.bf16.msra.mxu0 %v3528_v47 }
 0x6cd   :  { %3530 = vmatprep.subr.bf16.mxu0 %v3750_v30  ;;  %3193 = vmatpush3.bf16.msra.mxu1 %v3701_v42 }
 0x6ce   :  { %3533 = vmatprep.subr.bf16.mxu1 %v3750_v30 }
 0x6d0   :  { %3532 = vmatpush3.bf16.msra.mxu0 %v3531_v50 }
 0x6d1   :  { %3200 = vmatprep.subr.bf16.mxu0 %v3670_v52 }
 0x79e   :  { %v1875_v55 = vpop.f32.mrb[14].mxu0 }
 0x79f   :  { %v1879_v56 = vmul.f32 0.03125, %v1875_v55  ;;  %v3386_v57 = vpop.f32.mrb[15].mxu0 }
 0x7a1   :  { %v1880_v58 = vmul.f32 %v1879_v56, %v1879_v56 }
 0x7a3   :  { %v1882_v59 = vrot.slane %v1880_v58, 7 }
 0x7a5   :  { %v1884_v0 = vsub.f32 %v1879_v56, %v1882_v59 }
 0x7a7   :  { %v1886_v2 = vadd.f32 1e-05, %v1884_v0 }
 0x7a9   :  { %3722 = vrsqrt.f32 %v1886_v2 }
 0x7b3   :  { %v3723_v62 = vpop.eup %3722 }
 0x7b4   :  { %v1895_v63 = vrot.slane %v3723_v62, %v4117_v60 }
 0x7b6   :  { %v1896_v22 = vcombine.high %v1895_v63, %v1895_v63 }
 0x7b8   :  { %v1903_v3 = vrot.slane %v1896_v22, %v4117_v60 }
 0x7ba   :  { %v1905_v4 = vmul.f32 %v1903_v3, %v1885_v1 }
 0x7bc   :  { %v1907_v6 = vmul.f32 %v1905_v4, %v1879_v56 }
 0x7be   :  { %v1908_v8 = vsub.f32 %v1906_v5, %v1907_v6 }
 0x7c0   :  { %v1913_v9 = vrot.slane %v1908_v8, %v4128_v7  ;;  %v2406_v8 = vld [vmem:[%s4813_s17] sm:$0xff] }
 0x7c2   :  { %v1915_v11 = vsel %vm97_vm1, %v1905_v4, %v1913_v9  ;;  %v2407_v9 = vld [vmem:[%s4813_s17 + $0x8] sm:$0xff] }
 0x7c3   :  { %3396 = vmatmul.mubr.msk.f32.vlgmr.msra.gmra.mrb[20].mxu0 %vm1920_vm14, %v1915_v11 }
 0x7c4   :  { %3201 = vmatpush3.bf16.msra.mxu0 %v3671_v10 }
 0x7c5   :  { %3202 = vmatprep.subr.bf16.mxu0 %v3674_v12 }
 0x7c8   :  { %3203 = vmatpush3.bf16.msra.mxu0 %v3675_v13 }
 0x7c9   :  { %3204 = vmatprep.subr.bf16.mxu0 %v3678_v16 }
 0x7cc   :  { %3205 = vmatpush3.bf16.msra.mxu0 %v3679_v18  ;;  %v3534_v18 = vpack.c.bf16 %v2407_v9, %v2406_v8  ;;  %v2530_v8 = vld [vmem:[%s4814_s18 + $0x8] sm:$0xff] }
 0x7cd   :  { %3206 = vmatprep.subr.bf16.mxu0 %v3682_v21  ;;  %v2409_v21 = vld [vmem:[%s4813_s17 + $0x18] sm:$0xff] }
 0x7d0   :  { %3207 = vmatpush3.bf16.msra.mxu0 %v3683_v23  ;;  %v3537_v23 = vpack.c.bf16 %v2409_v21, %v2408_v20  ;;  %v3702_v20 = vld [vmem:[%s4817_s21 + $0x40] sm:$0xff]  }
 0x7d1   :  { %3208 = vmatprep.subr.bf16.mxu0 %v3686_v26  ;;  %v3540_v26 = vpack.c.bf16 %v2411_v25, %v2410_v24 }
 0x7d4   :  { %3209 = vmatpush3.bf16.msra.mxu0 %v3687_v27  ;;  %v2413_v27 = vld [vmem:[%s4813_s17 + $0x38] sm:$0xff] }
 0x7d5   :  { %3210 = vmatprep.subr.bf16.mxu0 %v3690_v32  ;;  %v2415_v32 = vld [vmem:[%s4813_s17 + $0x48] sm:$0xff] }
 0x7d8   :  { %3211 = vmatpush3.bf16.msra.mxu0 %v3691_v61  ;;  %v3546_v61 = vpack.c.bf16 %v2415_v32, %v2414_v29  ;;  %v2498_v32 = vld [vmem:[%s4815_s19] sm:$0x1]  ;;  %s2816_s19 = sshll.u32 %s3754_s29, 4  ;;  %s2817_s19 = int_to_ptr.vmem [resolvable:$true] %s2816_s19 }
 0x7d9   :  { %3212 = vmatprep.subr.bf16.mxu0 %v3694_v34  ;;  %v3549_v34 = vpack.c.bf16 %v2417_v33, %v2416_v17  ;;  %v2519_v33 = vld [vmem:[%s4816_s20] sm:$0x1]  ;;  %p3731_p1 = scmp.lt.s32.totalorder %s2817_s19, %s2817_s19 }
 0x7dc   :  { %3213 = vmatpush3.bf16.msra.mxu0 %v3695_v36  ;;  %v2419_v36 = vld [vmem:[%s4813_s17 + $0x68] sm:$0xff] }
 0x7dd   :  { %3214 = vmatprep.subr.bf16.mxu0 %v3698_v37  ;;  %v3552_v37 = vpack.c.bf16 %v2419_v36, %v2418_v35 }
 0x7e0   :  { %3215 = vmatpush3.bf16.msra.mxu0 %v3699_v40  ;;  %v3555_v40 = vpack.c.bf16 %v2421_v39, %v2420_v38  ;;  %v3704_v38 = vld [vmem:[%s4817_s21 + $0x48] sm:$0xff]  }
 0x7e1   :  { %3557 = vmatprep.subr.bf16.mxu0 %v3750_v30  ;;  %v3705_v39 = vld [vmem:[%s4817_s21 + $0x8] sm:$0xff]  }
 0x896   :  { %v1990_v43 = vpop.f32.mrb[20].mxu0 }
 0x897   :  { %v1997_v44 = vrot.slane %v1990_v43, %v4128_v7  ;;  %v3397_v45 = vpop.f32.mrb[21].mxu0  ;;  %v2002_v47 = vrot.slane %v1990_v43, %v4216_v41 }
 0x899   :  { %v1998_v46 = vmul.f32 %v1997_v44, %v4485_v31 }
 0x89b   :  { %v2003_v48 = vadd.f32 %v2002_v47, %v1998_v46 }
 0x89d   :  { %vm2004_vm15 = vcmp.ge.f32.partialorder %v2003_v48, 0.0  ;;  %v2005_v49 = vmul.f32 0.2, %v2003_v48 }
 0x89f   :  { %v2006_v50 = vsel %vm2004_vm15, %v2003_v48, %v2005_v49 }
 0x8a0   :  { %v2008_v52 = vrot.slane %v2006_v50, 7  ;;  %v2010_v53 = vrot.slane %v2006_v50, 5 }
 0x8a2   :  { %v2012_v54 = vsel %vm97_vm1, 0.0, %v2008_v52  ;;  %v2019_v55 = vsel %vm114_vm2, %v2010_v53, 0.0  ;;  %vm2537_vm2 = vcmask 523264  }
 0x8a3   :  { %v2014_v56 = vsel %vm2013_vm0, %v2012_v54, 0.0  ;;  %2021 = vst [vmem:[#allocation2 + $0x8] sm:$0xf] %v2019_v55 }
 0x8a4   :  { %v2016_v57 = vsel %vm2015_vm5, %v2014_v56, 0.0 }
 0x8a5   :  { %v2018_v58 = vsel %vm2017_vm6, %v2016_v57, %v2010_v53 }
 0x8a6   :  { %2020 = vst [vmem:[#allocation2] sm:$0xff] %v2018_v58 }
 0x8aa   :  { %v2045_v31 = vld [vmem:[#allocation2 + $0x9] ss:$2 sm:$0x3]  ;;  %v2038_v59 = vld [vmem:[#allocation2 + $0x8] ss:$2 sm:$0x3] }
 0x8ab   :  { %v2047_v0 = vrot.slane %v2045_v31, 6  ;;  %v2040_v2 = vrot.slane %v2038_v59, 6 }
 0x8ad   :  { %v2043_v62 = vld [vmem:[#allocation2 + $0x3] ss:$2 sm:$0x3]  ;;  %v2036_v63 = vld [vmem:[#allocation2 + $0x2] ss:$2 sm:$0x3] }
 0x8ae   :  { %v2049_v22 = vsel %vm129_vm3, %v2043_v62, %v2047_v0  ;;  %v2042_v1 = vsel %vm129_vm3, %v2036_v63, %v2040_v2  ;;  %v2031_v3 = vld [vmem:[#allocation2 + $0x7] ss:$2 sm:$0x3]  ;;  %v2029_v10 = vld [vmem:[#allocation2 + $0x1] ss:$2 sm:$0x3] }
 0x8af   :  { %v2053_v4 = vpack.c.bf16 %v2049_v22, %v2049_v22  ;;  %v2052_v5 = vpack.c.bf16 %v2042_v1, %v2042_v1  ;;  %v2033_v6 = vrot.slane %v2031_v3, 6  ;;  %v2024_v11 = vld [vmem:[#allocation2 + $0x6] ss:$2 sm:$0x3] }
 0x8b0   :  { %v2026_v13 = vrot.slane %v2024_v11, 6  ;;  %v2022_v15 = vld [vmem:[#allocation2] ss:$2 sm:$0x3]  ;;  %v2532_v11 = vld [vmem:[%s4814_s18 + $0x18] sm:$0xff] }
 0x8b1   :  { %2382 = vmatprep.mubr.bf16.mxu0 %v2053_v4  ;;  %v2035_v12 = vsel %vm129_vm3, %v2029_v10, %v2033_v6  ;;  %v2529_v6 = vld [vmem:[%s4814_s18] sm:$0xff]  ;;  %v2531_v10 = vld [vmem:[%s4814_s18 + $0x10] sm:$0xff] }
 0x8b2   :  { %2383 = vmatmul.mubr.bf16.vlgmr.msra.gmra.mrb[24].mxu0 %v2052_v5  ;;  %v2051_v14 = vpack.c.bf16 %v2035_v12, %v2035_v12  ;;  %v2028_v16 = vsel %vm129_vm3, %v2022_v15, %v2026_v13  ;;  %v3558_v9 = vpack.c.bf16 %v2530_v8, %v2529_v6  ;;  %v3561_v12 = vpack.c.bf16 %v2532_v11, %v2531_v10  ;;  %v2533_v13 = vld [vmem:[%s4814_s18 + $0x20] sm:$0xff] }
 0x8b3   :  { %3449 = vmatprep.mubr.msk.f32.mxu0 %vm3751_vm4, %v3752_v51  ;;  %v2050_v19 = vpack.c.bf16 %v2028_v16, %v2028_v16  ;;  %v2535_v16 = vld [vmem:[%s4814_s18 + $0x30] sm:$0xff] }
 0x8b4   :  { %2342 = vmatprep.mubr.bf16.mxu1 %v2051_v14  ;;  %3559 = vmatpush3.bf16.msra.mxu0 %v3558_v9  ;;  %v2534_v14 = vld [vmem:[%s4814_s18 + $0x28] sm:$0xff] }
 0x8b5   :  { %2343 = vmatmul.mubr.bf16.vlgmr.msra.gmra.mrb[24].mxu1 %v2050_v19  ;;  %3560 = vmatprep.subr.bf16.mxu0 %v3750_v30  ;;  %v3564_v15 = vpack.c.bf16 %v2534_v14, %v2533_v13 }
 0x8b6   :  { %3535 = vmatpush3.bf16.msra.mxu1 %v3534_v18  ;;  %3430 = vmatprep.mubr.msk.f32.mxu1 %vm3751_vm4, %v3752_v51  ;;  %v2412_v51 = vld [vmem:[%s4813_s17 + $0x30] sm:$0xff]  ;;  %v2536_v18 = vld [vmem:[%s4814_s18 + $0x38] sm:$0xff]  ;;  %s3726_s17 = scalar_lea.vmem %s2817_s19, 32 }
 0x8b7   :  { %3536 = vmatprep.subr.bf16.mxu1 %v3750_v30  ;;  %v3543_v28 = vpack.c.bf16 %v2413_v27, %v2412_v51  ;;  %v3567_v19 = vpack.c.bf16 %v2536_v18, %v2535_v16  ;;  %p3727_p0 = scmp.ne.s32.totalorder %s2817_s19, %s3726_s17  ;;  %p3732_p2 = scmp.lt.s32.totalorder %s3726_s17, %s3726_s17 }
 0x8b8   :  { %3562 = vmatpush3.bf16.msra.mxu0 %v3561_v12 }
 0x8b9   :  { %3563 = vmatprep.subr.bf16.mxu0 %v3750_v30  ;;  %p3733_p3 = por %p3732_p2, %p3731_p1 }
 0x8ba   :  { %3538 = vmatpush3.bf16.msra.mxu1 %v3537_v23 }
 0x8bb   :  { %3539 = vmatprep.subr.bf16.mxu1 %v3750_v30  ;;  %p3734_p4 = pnand %p3733_p3, %p3727_p0 }
 0x8bc   :  { %3565 = vmatpush3.bf16.msra.mxu0 %v3564_v15 }
 0x8bd   :  { %3566 = vmatprep.subr.bf16.mxu0 %v3750_v30 }
 0x8be   :  { %3541 = vmatpush3.bf16.msra.mxu1 %v3540_v26 }
 0x8bf   :  { %3542 = vmatprep.subr.bf16.mxu1 %v3750_v30 }
 0x8c0   :  { %3568 = vmatpush3.bf16.msra.mxu0 %v3567_v19 }
 0x8c1   :  { %3248 = vmatprep.subr.bf16.mxu0 %v3702_v20 }
 0x8c2   :  { %3544 = vmatpush3.bf16.msra.mxu1 %v3543_v28 }
 0x8c3   :  { %3545 = vmatprep.subr.bf16.mxu1 %v3750_v30 }
 0x8c6   :  { %3547 = vmatpush3.bf16.msra.mxu1 %v3546_v61 }
 0x8c7   :  { %3548 = vmatprep.subr.bf16.mxu1 %v3750_v30 }
 0x8ca   :  { %3550 = vmatpush3.bf16.msra.mxu1 %v3549_v34 }
 0x8cb   :  { %3551 = vmatprep.subr.bf16.mxu1 %v3750_v30 }
 0x8ce   :  { %3553 = vmatpush3.bf16.msra.mxu1 %v3552_v37  ;;  %v3703_v37 = vld [vmem:[%s4817_s21] sm:$0xff]  }
 0x8cf   :  { %3554 = vmatprep.subr.bf16.mxu1 %v3750_v30 }
 0x8d2   :  { %3556 = vmatpush3.bf16.msra.mxu1 %v3555_v40  ;;  %v3706_v40 = vld [vmem:[%s4817_s21 + $0x50] sm:$0xff]  }
 0x985   :  { %v3216_v42 = vpop.f32.mrb[24].mxu0 }
 0x986   :  { %v3217_v43 = vpop.f32.mrb[25].mxu0 }
 0x987   :  { %v3218_v44 = vadd.f32 %v3217_v43, %v3216_v42  ;;  %v3219_v45 = vpop.f32.mrb[26].mxu0  ;;  %v3707_v42 = vld [vmem:[%s4817_s21 + $0x10] sm:$0xff]   ;;  %v3708_v43 = vld [vmem:[%s4817_s21 + $0x58] sm:$0xff]  }
 0x988   :  { %v3220_v46 = vpop.f32.mrb[27].mxu0  ;;  %v3194_v47 = vpop.f32.mrb[24].mxu1  ;;  %v3710_v45 = vld [vmem:[%s4817_s21 + $0x60] sm:$0xff]  }
 0x989   :  { %v3195_v48 = vpop.f32.mrb[25].mxu1  ;;  %v3711_v46 = vld [vmem:[%s4817_s21 + $0x20] sm:$0xff]  }
 0x98a   :  { %v3196_v49 = vadd.f32 %v3195_v48, %v3194_v47  ;;  %v3197_v50 = vpop.f32.mrb[26].mxu1  ;;  %v3712_v47 = vld [vmem:[%s4817_s21 + $0x68] sm:$0xff]  }
 0x98b   :  { %v3198_v52 = vpop.f32.mrb[27].mxu1  ;;  %v3713_v48 = vld [vmem:[%s4817_s21 + $0x28] sm:$0xff]   ;;  %v3715_v50 = vld [vmem:[%s4817_s21 + $0x30] sm:$0xff]  }
 0x98c   :  { %v4683_v53 = vadd.f32 %v3218_v44, %v3196_v49  ;;  %v3709_v44 = vld [vmem:[%s4817_s21 + $0x18] sm:$0xff]   ;;  %v3714_v49 = vld [vmem:[%s4817_s21 + $0x70] sm:$0xff]  }
 0x98d   :  { %v3716_v52 = vld [vmem:[%s4817_s21 + $0x78] sm:$0xff]  }
 0x98e   :  { %v2390_v54 = vsel %vm1416_vm13, %v4683_v53, 0.0  ;;  %v2397_v55 = vmul.f32 %v4683_v53, %v4683_v53 }
 0x98f   :  { %v2391_v56 = vrot.slane %v2390_v54, 4 }
 0x990   :  { %v2398_v57 = vsel %vm1416_vm13, %v2397_v55, 0.0 }
 0x991   :  { %v2392_v58 = vadd.f32 %v2391_v56, %v2390_v54  ;;  %v2399_v31 = vrot.slane %v2398_v57, 4  ;;  %v3717_v54 = vld [vmem:[%s4817_s21 + $0x38] sm:$0xff]  }
 0x993   :  { %v2393_v59 = vrot.slane %v2392_v58, 2  ;;  %v2400_v0 = vadd.f32 %v2399_v31, %v2398_v57 }
 0x995   :  { %v2394_v2 = vadd.f32 %v2393_v59, %v2392_v58  ;;  %v2401_v62 = vrot.slane %v2400_v0, 2 }
 0x997   :  { %v2395_v63 = vrot.slane %v2394_v2, 1  ;;  %v2402_v22 = vadd.f32 %v2401_v62, %v2400_v0 }
 0x999   :  { %v2403_v1 = vrot.slane %v2402_v22, 1  ;;  %v2396_v3 = vadd.f32 %v2395_v63, %v2394_v2 }
 0x99b   :  { %v2404_v4 = vadd.f32 %v2403_v1, %v2402_v22 }
 0x99d   :  { %v2405_v5 = vsel %vm97_vm1, %v2396_v3, %v2404_v4 }
 0x99e   :  { %3431 = vmatmul.mubr.f32.vlgmr.msra.gmra.mrb[18].mxu1 %v2405_v5 }
 0xa71   :  { %v2488_v21 = vpop.f32.mrb[18].mxu1 }
 0xa72   :  { %v2492_v23 = vmul.f32 0.125, %v2488_v21  ;;  %v3432_v24 = vpop.f32.mrb[19].mxu1 }
 0xa74   :  { %v2493_v25 = vmul.f32 %v2492_v23, %v2492_v23 }
 0xa76   :  { %v2495_v30 = vrot.slane %v2493_v25, 7 }
 0xa78   :  { %v2497_v26 = vsub.f32 %v2492_v23, %v2495_v30 }
 0xa7a   :  { %v2499_v51 = vadd.f32 1e-05, %v2497_v26 }
 0xa7c   :  { %3724 = vrsqrt.f32 %v2499_v51 }
 0xa86   :  { %v3725_v27 = vpop.eup %3724 }
 0xa87   :  { %v2508_v28 = vrot.slane %v3725_v27, %v4117_v60 }
 0xa89   :  { %v2509_v29 = vcombine.high %v2508_v28, %v2508_v28 }
 0xa8b   :  { %v2516_v61 = vrot.slane %v2509_v29, %v4117_v60 }
 0xa8d   :  { %v2518_v17 = vmul.f32 %v2516_v61, %v2498_v32 }
 0xa8f   :  { %v2520_v34 = vmul.f32 %v2518_v17, %v2492_v23 }
 0xa91   :  { %v2521_v35 = vsub.f32 %v2519_v33, %v2520_v34 }
 0xa93   :  { %v2526_v36 = vrot.slane %v2521_v35, %v4128_v7 }
 0xa95   :  { %v2528_v60 = vsel %vm97_vm1, %v2518_v17, %v2526_v36 }
 0xa96   :  { %3450 = vmatmul.mubr.msk.f32.vlgmr.msra.gmra.mrb[22].mxu0 %vm2537_vm2, %v2528_v60 }
 0xa97   :  { %3249 = vmatpush3.bf16.msra.mxu0 %v3703_v37 }
 0xa98   :  { %3250 = vmatprep.subr.bf16.mxu0 %v3704_v38 }
 0xa9b   :  { %3251 = vmatpush3.bf16.msra.mxu0 %v3705_v39 }
 0xa9c   :  { %3252 = vmatprep.subr.bf16.mxu0 %v3706_v40 }
 0xa9f   :  { %3253 = vmatpush3.bf16.msra.mxu0 %v3707_v42 }
 0xaa0   :  { %3254 = vmatprep.subr.bf16.mxu0 %v3708_v43 }
 0xaa3   :  { %3255 = vmatpush3.bf16.msra.mxu0 %v3709_v44 }
 0xaa4   :  { %3256 = vmatprep.subr.bf16.mxu0 %v3710_v45 }
 0xaa7   :  { %3257 = vmatpush3.bf16.msra.mxu0 %v3711_v46 }
 0xaa8   :  { %3258 = vmatprep.subr.bf16.mxu0 %v3712_v47 }
 0xaab   :  { %3259 = vmatpush3.bf16.msra.mxu0 %v3713_v48 }
 0xaac   :  { %3260 = vmatprep.subr.bf16.mxu0 %v3714_v49 }
 0xaaf   :  { %3261 = vmatpush3.bf16.msra.mxu0 %v3715_v50 }
 0xab0   :  { %3262 = vmatprep.subr.bf16.mxu0 %v3716_v52 }
 0xab3   :  { %3263 = vmatpush3.bf16.msra.mxu0 %v3717_v54 }
 0xb69   :  { %v2607_v55 = vpop.f32.mrb[22].mxu0 }
 0xb6a   :  { %v2614_v56 = vrot.slane %v2607_v55, %v4128_v7  ;;  %v3451_v57 = vpop.f32.mrb[23].mxu0  ;;  %v2619_v31 = vrot.slane %v2607_v55, %v4216_v41 }
 0xb6c   :  { %v2615_v58 = vmul.f32 %v2614_v56, %v4683_v53  ;;  %v2956_v53 = vld [vmem:[%s4818_s22] ss:$0 sm:$0xff] }
 0xb6e   :  { %v2620_v59 = vadd.f32 %v2619_v31, %v2615_v58 }
 0xb70   :  { %vm2621_vm3 = vcmp.ge.f32.partialorder %v2620_v59, 0.0  ;;  %v2622_v0 = vmul.f32 0.2, %v2620_v59 }
 0xb72   :  { %v2623_v2 = vsel %vm2621_vm3, %v2620_v59, %v2622_v0 }
 0xb73   :  { %v2625_v62 = vrot.slane %v2623_v2, 1 }
 0xb75   :  { %v2627_v63 = vrot.slane %v2625_v62, 1  ;;  %v2629_v22 = vsel %vm97_vm1, %v2623_v2, %v2625_v62 }
 0xb76   :  { %v2631_v4 = vpack.c.bf16 %v2629_v22, %v2629_v22 }
 0xb77   :  { %v2630_v1 = vsel %vm97_vm1, %v2625_v62, %v2627_v63 }
 0xb78   :  { %v2632_v3 = vpack.c.bf16 %v2630_v1, %v2630_v1 }
 0xb7a   :  { %2800 = vmatprep.mubr.bf16.mxu0 %v2632_v3 }
 0xb7b   :  { %2801 = vmatmul.mubr.bf16.vlgmr.msra.gmra.mrb[28].mxu0 %v2631_v4 }
 0xc4e   :  { %v3264_v7 = vpop.f32.mrb[28].mxu0 }
 0xc4f   :  { %v3265_v41 = vpop.f32.mrb[29].mxu0 }
 0xc50   :  { %v3266_v5 = vadd.f32 %v3265_v41, %v3264_v7  ;;  %v3267_v6 = vpop.f32.mrb[30].mxu0 }
 0xc51   :  { %v3268_v8 = vpop.f32.mrb[31].mxu0 }
 0xc52   :  { %v2803_v9 = vadd.f32 %v3266_v5, %v2956_v53 }
 0xc54   :  { %v2808_v10 = vmax.f32 %v2803_v9, 0.0 }
 0xc56   :  { %2809 = vst [vmem:[#allocation3] sm:$0x3] %v2808_v10 }
 0xc57   :  { %3737 = shalt.err (!%p3734_p4)
}
 0xc58   :  { %s3738_s22 = scalar_lea.hbm %s4819_s23, 32 }
 0xc59   :  { %p3739_p5 = scmp.ne.s32.totalorder %s4819_s23, %s3738_s22  ;;  %p3742_p6 = scmp.lt.u32.totalorder %s3738_s22, %s4819_s23 }
 0xc5b   :  { %p3744_p7 = pnand %p3742_p6, %p3739_p5 }
 0xc5d   :  { %3747 = shalt.err (!%p3744_p7)
}
 0xc5e   :  { %2819 = dma.vmem_to_hbm [thread:$0]  %s2817_s19, 32, %s4819_s23, [#allocation4]  }
 0xc5f   :  { %3748 = dma.done.wait [#allocation4], 32  }
 0xc60   :  { %3749 = vsyncadd [#allocation4], 4294967264 }
 0xc61   :  { %2823 = vsyncpa [#allocation4], 1 }

</bundles_post_ra>
